<compile_context>
chip_gen: v6e
topology: v6e:2x2x1
jax: 0.10.0
libtpu: 0.0.40
codegen_flags: <defaults>
</compile_context>

<pallas_src>
import functools

import jax
import jax.numpy as jnp
from jax.experimental import pallas as pl
from jax.experimental.pallas import tpu as pltpu

# bf16 is the native MXU rate on v5e/v6e/v7x; accumulation is f32.
_MXU_DTYPE = jnp.bfloat16


def _conv3x3_bias_relu(a, w_ref, b):
    """VALID 3x3 conv + bias + ReLU on a halo'd slab.

    a:     (R, S, Cp) f32 activations (halo rows/cols included).
    w_ref: (3, 3*Cp, Cp) bf16 im2col weights; row index of dim 1 = kx*Cp + ci.
    b:     (1, Cp) f32 bias.
    Returns (R-2, S-2, Cp) f32 = relu(conv(a) + b).

    One K=3*Cp matmul per ky (3 accumulating matmuls) instead of one
    (M, 9*Cp) patch: 3x lower peak im2col VMEM at identical MXU efficiency.
    """
    R, S, Cp = a.shape
    OH, OW = R - 2, S - 2
    a16 = a.astype(_MXU_DTYPE)                                    # bf16 taps
    acc = jnp.zeros((OH * OW, Cp), jnp.float32)
    for ky in range(3):                                           # unrolled
        taps = [a16[ky:ky + OH, kx:kx + OW, :].reshape(OH * OW, Cp)
                for kx in range(3)]
        patch = jnp.concatenate(taps, axis=-1)                    # (OH*OW, 3*Cp)
        acc = acc + jnp.dot(patch, w_ref[ky],
                            preferred_element_type=jnp.float32)
    return jnp.maximum(acc + b, 0.0).reshape(OH, OW, Cp)


def _residual_block_kernel(H, W, TH, x_ref, w1_ref, b1_ref, w2_ref, b2_ref,
                           out_ref):
    # x_ref:   (1, H+4, W+2, Cp) spatially pre-padded image, resident across
    #          the row-tile grid axis (DMA'd once per image).
    # w*_ref:  (3, 3*Cp, Cp) bf16 im2col weights.  b*_ref: (1, Cp) f32.
    # out_ref: (1, TH, W, Cp) current output row tile.
    Cp = x_ref.shape[-1]
    t = pl.program_id(1)
    r0 = t * TH                                      # first output row of tile
    # Rows r0-2 .. r0+TH+1 of the (2-row zero-padded) image.
    slab = x_ref[0, pl.ds(r0, TH + 4)]               # (TH+4, W+2, Cp) f32

    # conv1 + relu1 over TH+2 rows (1-row halo each side for conv2).
    h1 = _conv3x3_bias_relu(slab, w1_ref, b1_ref[...])            # (TH+2, W, Cp)

    # h1 rows that fall outside the image are conv2's 'same' zero padding and
    # must be exactly zero (the computed values there contain the bias).
    gr = r0 - 1 + jax.lax.broadcasted_iota(jnp.int32, (TH + 2, 1, 1), 0)
    h1 = jnp.where((gr >= 0) & (gr < H), h1, 0.0)

    # 1-column zero halo for conv2's 'same' padding along W.
    zc = jnp.zeros((TH + 2, 1, Cp), jnp.float32)
    h1p = jnp.concatenate([zc, h1, zc], axis=1)                   # (TH+2, W+2, Cp)

    h2 = _conv3x3_bias_relu(h1p, w2_ref, b2_ref[...])             # (TH, W, Cp)

    # residual: relu2(conv2(relu1(conv1(x)))) + x
    res = slab[2:2 + TH, 1:1 + W, :]
    out_ref[0] = (h2 + res).astype(out_ref.dtype)


def residual_block_pallas(x_nchw, w1, b1, w2, b2, *, tile_h=8):
    """x_nchw: (N, C, H, W) f32.  w*: (cout, cin, 3, 3) PyTorch OIHW.  b*: (cout,).

    At production sizes pick tile_h so H // tile_h gives each core >= 4-8 grid
    steps (smaller tiles on v7x, larger on v5e/v6e).  W should be a multiple
    of 8 for layout-free reshapes (true for typical image sizes).
    """
    N, C, H, W = x_nchw.shape
    Cp = ((C + 127) // 128) * 128                     # lane-dense channels
    TH = max(1, min(tile_h, H))
    while H % TH:                                     # TH must divide H
        TH -= 1
    T = H // TH

    # NHWC, channels zero-padded to Cp; 2-row / 1-col spatial zero halo so the
    # kernel never rebuilds the x halo.  Padded lanes stay exactly zero through
    # conv/bias/relu/residual, so slicing them off at the end is exact.
    x = jnp.transpose(x_nchw, (0, 2, 3, 1)).astype(jnp.float32)
    x = jnp.pad(x, ((0, 0), (2, 2), (1, 1), (0, Cp - C)))
    Hp, Wp = H + 4, W + 2

    def prep_w(w):
        wk = jnp.transpose(w, (2, 3, 1, 0)).astype(jnp.float32)   # (ky,kx,ci,co)
        wk = jnp.pad(wk, ((0, 0), (0, 0), (0, Cp - C), (0, Cp - C)))
        return wk.reshape(3, 3 * Cp, Cp).astype(jnp.bfloat16)     # bf16 weights

    def prep_b(b):
        return jnp.pad(b.astype(jnp.float32), (0, Cp - C)).reshape(1, Cp)

    w1k, w2k = prep_w(w1), prep_w(w2)
    b1k, b2k = prep_b(b1), prep_b(b2)

    kernel = functools.partial(_residual_block_kernel, H, W, TH)

    out_nhwc = pl.pallas_call(
        kernel,
        out_shape=jax.ShapeDtypeStruct((N, H, W, Cp), jnp.float32),
        grid_spec=pltpu.PrefetchScalarGridSpec(
            num_scalar_prefetch=0,
            grid=(N, T),
            in_specs=[
                # Whole padded image; index_map constant over t -> DMA'd once
                # per image, resident across the row-tile axis.
                pl.BlockSpec((1, Hp, Wp, Cp), lambda n, t: (n, 0, 0, 0)),
                pl.BlockSpec((3, 3 * Cp, Cp), lambda n, t: (0, 0, 0)),
                pl.BlockSpec((1, Cp), lambda n, t: (0, 0)),
                pl.BlockSpec((3, 3 * Cp, Cp), lambda n, t: (0, 0, 0)),
                pl.BlockSpec((1, Cp), lambda n, t: (0, 0)),
            ],
            out_specs=pl.BlockSpec((1, TH, W, Cp), lambda n, t: (n, t, 0, 0)),
        ),
        compiler_params=pltpu.CompilerParams(
            dimension_semantics=("parallel", "arbitrary"),
            vmem_limit_bytes=64 * 1024 * 1024),
    )(x, w1k, b1k, w2k, b2k)

    return jnp.transpose(out_nhwc[..., :C], (0, 3, 1, 2))         # back to NCHW


def residual_block_ref(x_nchw, w1, b1, w2, b2):
    """Pure-JAX f32 reference matching the PyTorch module (NCHW / OIHW)."""
    dn = ("NCHW", "OIHW", "NCHW")
    conv = lambda x, w: jax.lax.conv_general_dilated(
        x, w, window_strides=(1, 1), padding=((1, 1), (1, 1)),
        dimension_numbers=dn, precision=jax.lax.Precision.HIGHEST)
    h = jnp.maximum(conv(x_nchw, w1) + b1[None, :, None, None], 0.0)
    h = jnp.maximum(conv(h, w2) + b2[None, :, None, None], 0.0)
    return h + x_nchw


if __name__ == "__main__":
    key = jax.random.PRNGKey(0)
    k_x, k_w1, k_b1, k_w2, k_b2 = jax.random.split(key, 5)

    N, C, H, W = 2, 3, 16, 16
    x = jax.random.normal(k_x, (N, C, H, W), dtype=jnp.float32)

    # Deterministic Conv2d(3, 3, 3, padding=1) parameters (kaiming-uniform-like bound).
    fan_in = C * 3 * 3
    bound = 1.0 / (fan_in ** 0.5)
    w1 = jax.random.uniform(k_w1, (C, C, 3, 3), jnp.float32, -bound, bound)
    b1 = jax.random.uniform(k_b1, (C,), jnp.float32, -bound, bound)
    w2 = jax.random.uniform(k_w2, (C, C, 3, 3), jnp.float32, -bound, bound)
    b2 = jax.random.uniform(k_b2, (C,), jnp.float32, -bound, bound)

    out = residual_block_pallas(x, w1, b1, w2, b2, tile_h=8)
    jax.block_until_ready(out)

    ref = residual_block_ref(x, w1, b1, w2, b2)
    assert out.shape == (N, C, H, W)
    # bf16 MXU inputs (f32 accumulation) -> bf16-appropriate tolerance vs the
    # full-f32 reference.
    assert jnp.allclose(out, ref, atol=2e-2, rtol=2e-2), (
        float(jnp.max(jnp.abs(out - ref))))

    print("KERNEL_OK")
</pallas_src>

<mosaic_0001>
module attributes {stable_mosaic.version = 11 : i64} {
  func.func @_residual_block_kernel(%arg0: i32, %arg1: i32, %arg2: memref<1x20x18x128xf32, #tpu.memory_space<vmem>>, %arg3: memref<3x384x128xbf16, #tpu.memory_space<vmem>>, %arg4: memref<1x128xf32, #tpu.memory_space<vmem>>, %arg5: memref<3x384x128xbf16, #tpu.memory_space<vmem>>, %arg6: memref<1x128xf32, #tpu.memory_space<vmem>>, %arg7: memref<1x8x16x128xf32, #tpu.memory_space<vmem>>) attributes {dimension_semantics = [#tpu.dimension_semantics<parallel>, #tpu.dimension_semantics<arbitrary>], iteration_bounds = array<i64: 2, 2>, scalar_prefetch = 0 : i64, scratch_operands = 0 : i64, tpu.core_type = #tpu.core_type<tc>, window_params = [{transform_indices = @transform_0, window_bounds = array<i64: 1, 20, 18, 128>}, {pipeline_mode = #tpu.pipeline_mode<synchronous>, transform_indices = @transform_1, window_bounds = array<i64: 3, 384, 128>}, {pipeline_mode = #tpu.pipeline_mode<synchronous>, transform_indices = @transform_2, window_bounds = array<i64: 1, 128>}, {pipeline_mode = #tpu.pipeline_mode<synchronous>, transform_indices = @transform_3, window_bounds = array<i64: 3, 384, 128>}, {pipeline_mode = #tpu.pipeline_mode<synchronous>, transform_indices = @transform_4, window_bounds = array<i64: 1, 128>}, {transform_indices = @transform_5, window_bounds = array<i64: 1, 8, 16, 128>}]} {
    %c8_i32 = arith.constant 8 : i32
    %0 = arith.muli %arg1, %c8_i32 : i32
    %c0 = arith.constant 0 : index
    %1 = arith.index_cast %0 : i32 to index
    %c0_0 = arith.constant 0 : index
    %c0_1 = arith.constant 0 : index
    %2 = vector.load %arg2[%c0, %1, %c0_0, %c0_1] : memref<1x20x18x128xf32, #tpu.memory_space<vmem>>, vector<1x12x18x128xf32>
    %3 = vector.shape_cast %2 : vector<1x12x18x128xf32> to vector<12x18x128xf32>
    %c0_2 = arith.constant 0 : index
    %c0_3 = arith.constant 0 : index
    %4 = vector.load %arg4[%c0_2, %c0_3] : memref<1x128xf32, #tpu.memory_space<vmem>>, vector<1x128xf32>
    %5 = arith.truncf %3 : vector<12x18x128xf32> to vector<12x18x128xbf16>
    %cst = arith.constant 0.000000e+00 : f32
    %6 = vector.broadcast %cst : f32 to vector<160x128xf32>
    %7 = vector.extract_strided_slice %5 {offsets = [0, 0, 0], sizes = [10, 16, 128], strides = [1, 1, 1]} : vector<12x18x128xbf16> to vector<10x16x128xbf16>
    %8 = vector.shape_cast %7 : vector<10x16x128xbf16> to vector<160x128xbf16>
    %9 = vector.extract_strided_slice %5 {offsets = [0, 1, 0], sizes = [10, 16, 128], strides = [1, 1, 1]} : vector<12x18x128xbf16> to vector<10x16x128xbf16>
    %10 = vector.shape_cast %9 : vector<10x16x128xbf16> to vector<160x128xbf16>
    %11 = vector.extract_strided_slice %5 {offsets = [0, 2, 0], sizes = [10, 16, 128], strides = [1, 1, 1]} : vector<12x18x128xbf16> to vector<10x16x128xbf16>
    %12 = vector.shape_cast %11 : vector<10x16x128xbf16> to vector<160x128xbf16>
    %13 = tpu.concatenate %8, %10, %12 in 1 : vector<160x128xbf16>, vector<160x128xbf16>, vector<160x128xbf16> -> vector<160x384xbf16>
    %c0_4 = arith.constant 0 : index
    %c0_5 = arith.constant 0 : index
    %c0_6 = arith.constant 0 : index
    %14 = vector.load %arg3[%c0_4, %c0_5, %c0_6] : memref<3x384x128xbf16, #tpu.memory_space<vmem>>, vector<1x384x128xbf16>
    %15 = vector.shape_cast %14 : vector<1x384x128xbf16> to vector<384x128xbf16>
    %cst_7 = arith.constant dense<0.000000e+00> : vector<160x128xf32>
    %16 = tpu.matmul %13, %15, %cst_7 {dimension_numbers = #tpu.dot_dimension_numbers<[1], [0], [0], [1], [0, 0, 1, 1], [], []>} : vector<160x384xbf16>, vector<384x128xbf16>, vector<160x128xf32> -> vector<160x128xf32>
    %17 = arith.addf %6, %16 : vector<160x128xf32>
    %18 = vector.extract_strided_slice %5 {offsets = [1, 0, 0], sizes = [10, 16, 128], strides = [1, 1, 1]} : vector<12x18x128xbf16> to vector<10x16x128xbf16>
    %19 = vector.shape_cast %18 : vector<10x16x128xbf16> to vector<160x128xbf16>
    %20 = vector.extract_strided_slice %5 {offsets = [1, 1, 0], sizes = [10, 16, 128], strides = [1, 1, 1]} : vector<12x18x128xbf16> to vector<10x16x128xbf16>
    %21 = vector.shape_cast %20 : vector<10x16x128xbf16> to vector<160x128xbf16>
    %22 = vector.extract_strided_slice %5 {offsets = [1, 2, 0], sizes = [10, 16, 128], strides = [1, 1, 1]} : vector<12x18x128xbf16> to vector<10x16x128xbf16>
    %23 = vector.shape_cast %22 : vector<10x16x128xbf16> to vector<160x128xbf16>
    %24 = tpu.concatenate %19, %21, %23 in 1 : vector<160x128xbf16>, vector<160x128xbf16>, vector<160x128xbf16> -> vector<160x384xbf16>
    %c1 = arith.constant 1 : index
    %c0_8 = arith.constant 0 : index
    %c0_9 = arith.constant 0 : index
    %25 = vector.load %arg3[%c1, %c0_8, %c0_9] : memref<3x384x128xbf16, #tpu.memory_space<vmem>>, vector<1x384x128xbf16>
    %26 = vector.shape_cast %25 : vector<1x384x128xbf16> to vector<384x128xbf16>
    %cst_10 = arith.constant dense<0.000000e+00> : vector<160x128xf32>
    %27 = tpu.matmul %24, %26, %cst_10 {dimension_numbers = #tpu.dot_dimension_numbers<[1], [0], [0], [1], [0, 0, 1, 1], [], []>} : vector<160x384xbf16>, vector<384x128xbf16>, vector<160x128xf32> -> vector<160x128xf32>
    %28 = arith.addf %17, %27 : vector<160x128xf32>
    %29 = vector.extract_strided_slice %5 {offsets = [2, 0, 0], sizes = [10, 16, 128], strides = [1, 1, 1]} : vector<12x18x128xbf16> to vector<10x16x128xbf16>
    %30 = vector.shape_cast %29 : vector<10x16x128xbf16> to vector<160x128xbf16>
    %31 = vector.extract_strided_slice %5 {offsets = [2, 1, 0], sizes = [10, 16, 128], strides = [1, 1, 1]} : vector<12x18x128xbf16> to vector<10x16x128xbf16>
    %32 = vector.shape_cast %31 : vector<10x16x128xbf16> to vector<160x128xbf16>
    %33 = vector.extract_strided_slice %5 {offsets = [2, 2, 0], sizes = [10, 16, 128], strides = [1, 1, 1]} : vector<12x18x128xbf16> to vector<10x16x128xbf16>
    %34 = vector.shape_cast %33 : vector<10x16x128xbf16> to vector<160x128xbf16>
    %35 = tpu.concatenate %30, %32, %34 in 1 : vector<160x128xbf16>, vector<160x128xbf16>, vector<160x128xbf16> -> vector<160x384xbf16>
    %c2 = arith.constant 2 : index
    %c0_11 = arith.constant 0 : index
    %c0_12 = arith.constant 0 : index
    %36 = vector.load %arg3[%c2, %c0_11, %c0_12] : memref<3x384x128xbf16, #tpu.memory_space<vmem>>, vector<1x384x128xbf16>
    %37 = vector.shape_cast %36 : vector<1x384x128xbf16> to vector<384x128xbf16>
    %cst_13 = arith.constant dense<0.000000e+00> : vector<160x128xf32>
    %38 = tpu.matmul %35, %37, %cst_13 {dimension_numbers = #tpu.dot_dimension_numbers<[1], [0], [0], [1], [0, 0, 1, 1], [], []>} : vector<160x384xbf16>, vector<384x128xbf16>, vector<160x128xf32> -> vector<160x128xf32>
    %39 = arith.addf %28, %38 : vector<160x128xf32>
    %40 = vector.broadcast %4 : vector<1x128xf32> to vector<160x128xf32>
    %41 = arith.addf %39, %40 : vector<160x128xf32>
    %cst_14 = arith.constant 0.000000e+00 : f32
    %42 = vector.broadcast %cst_14 : f32 to vector<160x128xf32>
    %43 = arith.maximumf %41, %42 : vector<160x128xf32>
    %44 = vector.shape_cast %43 : vector<160x128xf32> to vector<10x16x128xf32>
    %c1_i32 = arith.constant 1 : i32
    %45 = arith.subi %0, %c1_i32 : i32
    %46 = tpu.iota {dimensions = array<i32: 0>} : vector<10x1x1xi32>
    %47 = vector.broadcast %45 : i32 to vector<10x1x1xi32>
    %48 = arith.addi %47, %46 : vector<10x1x1xi32>
    %c0_i32 = arith.constant 0 : i32
    %49 = vector.broadcast %c0_i32 : i32 to vector<10x1x1xi32>
    %50 = arith.cmpi sge, %48, %49 : vector<10x1x1xi32>
    %c16_i32 = arith.constant 16 : i32
    %51 = vector.broadcast %c16_i32 : i32 to vector<10x1x1xi32>
    %52 = arith.cmpi slt, %48, %51 : vector<10x1x1xi32>
    %53 = arith.andi %50, %52 : vector<10x1x1xi1>
    %cst_15 = arith.constant 0.000000e+00 : f32
    %54 = vector.shape_cast %53 : vector<10x1x1xi1> to vector<10x1x1xi1>
    %55 = vector.broadcast %54 : vector<10x1x1xi1> to vector<10x16x128xi1>
    %56 = vector.broadcast %cst_15 : f32 to vector<10x16x128xf32>
    %57 = arith.select %55, %44, %56 : vector<10x16x128xi1>, vector<10x16x128xf32>
    %cst_16 = arith.constant 0.000000e+00 : f32
    %58 = vector.broadcast %cst_16 : f32 to vector<10x1x128xf32>
    %59 = tpu.concatenate %58, %57, %58 in 1 : vector<10x1x128xf32>, vector<10x16x128xf32>, vector<10x1x128xf32> -> vector<10x18x128xf32>
    %c0_17 = arith.constant 0 : index
    %c0_18 = arith.constant 0 : index
    %60 = vector.load %arg6[%c0_17, %c0_18] : memref<1x128xf32, #tpu.memory_space<vmem>>, vector<1x128xf32>
    %61 = arith.truncf %59 : vector<10x18x128xf32> to vector<10x18x128xbf16>
    %cst_19 = arith.constant 0.000000e+00 : f32
    %62 = vector.broadcast %cst_19 : f32 to vector<128x128xf32>
    %63 = vector.extract_strided_slice %61 {offsets = [0, 0, 0], sizes = [8, 16, 128], strides = [1, 1, 1]} : vector<10x18x128xbf16> to vector<8x16x128xbf16>
    %64 = vector.shape_cast %63 : vector<8x16x128xbf16> to vector<128x128xbf16>
    %65 = vector.extract_strided_slice %61 {offsets = [0, 1, 0], sizes = [8, 16, 128], strides = [1, 1, 1]} : vector<10x18x128xbf16> to vector<8x16x128xbf16>
    %66 = vector.shape_cast %65 : vector<8x16x128xbf16> to vector<128x128xbf16>
    %67 = vector.extract_strided_slice %61 {offsets = [0, 2, 0], sizes = [8, 16, 128], strides = [1, 1, 1]} : vector<10x18x128xbf16> to vector<8x16x128xbf16>
    %68 = vector.shape_cast %67 : vector<8x16x128xbf16> to vector<128x128xbf16>
    %69 = tpu.concatenate %64, %66, %68 in 1 : vector<128x128xbf16>, vector<128x128xbf16>, vector<128x128xbf16> -> vector<128x384xbf16>
    %c0_20 = arith.constant 0 : index
    %c0_21 = arith.constant 0 : index
    %c0_22 = arith.constant 0 : index
    %70 = vector.load %arg5[%c0_20, %c0_21, %c0_22] : memref<3x384x128xbf16, #tpu.memory_space<vmem>>, vector<1x384x128xbf16>
    %71 = vector.shape_cast %70 : vector<1x384x128xbf16> to vector<384x128xbf16>
    %cst_23 = arith.constant dense<0.000000e+00> : vector<128x128xf32>
    %72 = tpu.matmul %69, %71, %cst_23 {dimension_numbers = #tpu.dot_dimension_numbers<[1], [0], [0], [1], [0, 0, 1, 1], [], []>} : vector<128x384xbf16>, vector<384x128xbf16>, vector<128x128xf32> -> vector<128x128xf32>
    %73 = arith.addf %62, %72 : vector<128x128xf32>
    %74 = vector.extract_strided_slice %61 {offsets = [1, 0, 0], sizes = [8, 16, 128], strides = [1, 1, 1]} : vector<10x18x128xbf16> to vector<8x16x128xbf16>
    %75 = vector.shape_cast %74 : vector<8x16x128xbf16> to vector<128x128xbf16>
    %76 = vector.extract_strided_slice %61 {offsets = [1, 1, 0], sizes = [8, 16, 128], strides = [1, 1, 1]} : vector<10x18x128xbf16> to vector<8x16x128xbf16>
    %77 = vector.shape_cast %76 : vector<8x16x128xbf16> to vector<128x128xbf16>
    %78 = vector.extract_strided_slice %61 {offsets = [1, 2, 0], sizes = [8, 16, 128], strides = [1, 1, 1]} : vector<10x18x128xbf16> to vector<8x16x128xbf16>
    %79 = vector.shape_cast %78 : vector<8x16x128xbf16> to vector<128x128xbf16>
    %80 = tpu.concatenate %75, %77, %79 in 1 : vector<128x128xbf16>, vector<128x128xbf16>, vector<128x128xbf16> -> vector<128x384xbf16>
    %c1_24 = arith.constant 1 : index
    %c0_25 = arith.constant 0 : index
    %c0_26 = arith.constant 0 : index
    %81 = vector.load %arg5[%c1_24, %c0_25, %c0_26] : memref<3x384x128xbf16, #tpu.memory_space<vmem>>, vector<1x384x128xbf16>
    %82 = vector.shape_cast %81 : vector<1x384x128xbf16> to vector<384x128xbf16>
    %cst_27 = arith.constant dense<0.000000e+00> : vector<128x128xf32>
    %83 = tpu.matmul %80, %82, %cst_27 {dimension_numbers = #tpu.dot_dimension_numbers<[1], [0], [0], [1], [0, 0, 1, 1], [], []>} : vector<128x384xbf16>, vector<384x128xbf16>, vector<128x128xf32> -> vector<128x128xf32>
    %84 = arith.addf %73, %83 : vector<128x128xf32>
    %85 = vector.extract_strided_slice %61 {offsets = [2, 0, 0], sizes = [8, 16, 128], strides = [1, 1, 1]} : vector<10x18x128xbf16> to vector<8x16x128xbf16>
    %86 = vector.shape_cast %85 : vector<8x16x128xbf16> to vector<128x128xbf16>
    %87 = vector.extract_strided_slice %61 {offsets = [2, 1, 0], sizes = [8, 16, 128], strides = [1, 1, 1]} : vector<10x18x128xbf16> to vector<8x16x128xbf16>
    %88 = vector.shape_cast %87 : vector<8x16x128xbf16> to vector<128x128xbf16>
    %89 = vector.extract_strided_slice %61 {offsets = [2, 2, 0], sizes = [8, 16, 128], strides = [1, 1, 1]} : vector<10x18x128xbf16> to vector<8x16x128xbf16>
    %90 = vector.shape_cast %89 : vector<8x16x128xbf16> to vector<128x128xbf16>
    %91 = tpu.concatenate %86, %88, %90 in 1 : vector<128x128xbf16>, vector<128x128xbf16>, vector<128x128xbf16> -> vector<128x384xbf16>
    %c2_28 = arith.constant 2 : index
    %c0_29 = arith.constant 0 : index
    %c0_30 = arith.constant 0 : index
    %92 = vector.load %arg5[%c2_28, %c0_29, %c0_30] : memref<3x384x128xbf16, #tpu.memory_space<vmem>>, vector<1x384x128xbf16>
    %93 = vector.shape_cast %92 : vector<1x384x128xbf16> to vector<384x128xbf16>
    %cst_31 = arith.constant dense<0.000000e+00> : vector<128x128xf32>
    %94 = tpu.matmul %91, %93, %cst_31 {dimension_numbers = #tpu.dot_dimension_numbers<[1], [0], [0], [1], [0, 0, 1, 1], [], []>} : vector<128x384xbf16>, vector<384x128xbf16>, vector<128x128xf32> -> vector<128x128xf32>
    %95 = arith.addf %84, %94 : vector<128x128xf32>
    %96 = vector.broadcast %60 : vector<1x128xf32> to vector<128x128xf32>
    %97 = arith.addf %95, %96 : vector<128x128xf32>
    %cst_32 = arith.constant 0.000000e+00 : f32
    %98 = vector.broadcast %cst_32 : f32 to vector<128x128xf32>
    %99 = arith.maximumf %97, %98 : vector<128x128xf32>
    %100 = vector.shape_cast %99 : vector<128x128xf32> to vector<8x16x128xf32>
    %101 = vector.extract_strided_slice %3 {offsets = [2, 1, 0], sizes = [8, 16, 128], strides = [1, 1, 1]} : vector<12x18x128xf32> to vector<8x16x128xf32>
    %102 = arith.addf %100, %101 : vector<8x16x128xf32>
    %c0_33 = arith.constant 0 : index
    %c0_34 = arith.constant 0 : index
    %c0_35 = arith.constant 0 : index
    %c0_36 = arith.constant 0 : index
    %103 = vector.load %arg7[%c0_33, %c0_34, %c0_35, %c0_36] : memref<1x8x16x128xf32, #tpu.memory_space<vmem>>, vector<1x8x16x128xf32>
    %104 = vector.shape_cast %103 : vector<1x8x16x128xf32> to vector<8x16x128xf32>
    %105 = vector.shape_cast %102 : vector<8x16x128xf32> to vector<1x8x16x128xf32>
    tpu.vector_store %arg7[%c0_33, %c0_34, %c0_35, %c0_36], %105 {strides = array<i32>} : memref<1x8x16x128xf32, #tpu.memory_space<vmem>>, vector<1x8x16x128xf32>,
    return
  }
  func.func @transform_0(%arg0: i32, %arg1: i32) -> (i32, i32, i32, i32) {
    %c0_i32 = arith.constant 0 : i32
    %c0_i32_0 = arith.constant 0 : i32
    %c0_i32_1 = arith.constant 0 : i32
    %c0_i32_2 = arith.constant 0 : i32
    return %arg0, %c0_i32, %c0_i32_0, %c0_i32_1 : i32, i32, i32, i32
  }
  func.func @transform_1(%arg0: i32, %arg1: i32) -> (i32, i32, i32) {
    %c0_i32 = arith.constant 0 : i32
    %c0_i32_0 = arith.constant 0 : i32
    %c0_i32_1 = arith.constant 0 : i32
    %c0_i32_2 = arith.constant 0 : i32
    return %c0_i32, %c0_i32_0, %c0_i32_1 : i32, i32, i32
  }
  func.func @transform_2(%arg0: i32, %arg1: i32) -> (i32, i32) {
    %c0_i32 = arith.constant 0 : i32
    %c0_i32_0 = arith.constant 0 : i32
    %c0_i32_1 = arith.constant 0 : i32
    return %c0_i32, %c0_i32_0 : i32, i32
  }
  func.func @transform_3(%arg0: i32, %arg1: i32) -> (i32, i32, i32) {
    %c0_i32 = arith.constant 0 : i32
    %c0_i32_0 = arith.constant 0 : i32
    %c0_i32_1 = arith.constant 0 : i32
    %c0_i32_2 = arith.constant 0 : i32
    return %c0_i32, %c0_i32_0, %c0_i32_1 : i32, i32, i32
  }
  func.func @transform_4(%arg0: i32, %arg1: i32) -> (i32, i32) {
    %c0_i32 = arith.constant 0 : i32
    %c0_i32_0 = arith.constant 0 : i32
    %c0_i32_1 = arith.constant 0 : i32
    return %c0_i32, %c0_i32_0 : i32, i32
  }
  func.func @transform_5(%arg0: i32, %arg1: i32) -> (i32, i32, i32, i32) {
    %c0_i32 = arith.constant 0 : i32
    %c0_i32_0 = arith.constant 0 : i32
    %c0_i32_1 = arith.constant 0 : i32
    return %arg0, %arg1, %c0_i32, %c0_i32_0 : i32, i32, i32, i32
  }
}

</mosaic_0001>

<bundles_post_ra>
// kernel: tpu_custom_call.1
= control target key start
LH: loop header
LB: loop body
LE: loop exit
PB: predicated region body
PF: predicated region fallthrough
CT: control target
= control target key end

     0   :  { %10 = vsyncpa [#allocation3], 0  ;;  %s7007_s0 = inlined_call_operand.vmem [shape: f32[2,20,18,128], index: 0, kind: input, shape index: {}]   ;;  %s7008_s1 = inlined_call_operand.vmem [shape: bf16[3,384,128], index: 1, kind: input, shape index: {}]   ;;  %s7009_s2 = inlined_call_operand.vmem [shape: f32[1,128], index: 2, kind: input, shape index: {}]   ;;  %s7010_s3 = inlined_call_operand.vmem [shape: bf16[3,384,128], index: 3, kind: input, shape index: {}]   ;;  %s7011_s4 = inlined_call_operand.vmem [shape: f32[1,128], index: 4, kind: input, shape index: {}]   ;;  %s7012_s5 = inlined_call_operand.hbm [shape: f32[2,16,16,128], index: 5, kind: output, shape index: {}]  }
   0x1   :  { %12 = vsyncpa [#allocation3 + $0x1], 0  ;;  %s5219_s18 = smov 0   ;;  %s5221_s19 = smov 0  }
   0x2   :  { %s5223_s20 = smov 0   ;;  %s5225_s21 = smov 0  }
   0x3   :  { %s5227_s22 = smov 0   ;;  %s5229_s23 = smov 0  }
   0x4   :  { %s5231_s24 = smov 0   ;;  %s5233_s25 = smov 0  }
   0x5 LB: > { %s3670_s26 = sadd.s32 4294967295, %s5183_s25   ;;  %s3671_s27 = sadd.s32 4294967294, %s5183_s25   ;;  %s5183_s25 = sphi %s5233_s25, %s18_s25   ;;  %s5179_s24 = sphi %s5231_s24, %s7045_s24   ;;  %s5175_s23 = sphi %s5229_s23, %s7044_s23   ;;  %s5171_s22 = sphi %s5227_s22, %s7043_s22   ;;  %s5167_s21 = sphi %s5225_s21, %s7042_s21   ;;  %s5163_s20 = sphi %s5223_s20, %s7041_s20   ;;  %s5159_s19 = sphi %s5221_s19, %s7040_s19   ;;  %s5155_s18 = sphi %s5219_s18, %s7039_s18  }
   0x6   : > { %s27_s28 = sadd.s32 1, %s5175_s23  ;;  %s30_s29 = sadd.s32 1, %s5179_s24 }
   0x7   : > { %p28_p0 = scmp.ge.s32.totalorder %s27_s28, 2  ;;  %p159_p1 = scmp.ne.s32.totalorder %s5163_s20, %s5159_s19 }
   0x8   : > { %p160_p2 = scmp.eq.s32.totalorder %s3670_s26, 3  ;;  %p165_p5 = scmp.ne.s32.totalorder %s5159_s19, %s5155_s18 }
   0x9   : > { %s7047_s28 = smov (%p28_p0, %s27_s28), 0  ;;  %s7049_s29 = smov (!%p28_p0, %s30_s29), %s5179_s24 }
   0xa   : > { %s145_s30 = ssub.s32 %s5175_s23, %s7047_s28  ;;  %p5270_p3 = por %p160_p2, %p159_p1 }
   0xb   : > { %p32_p4 = scmp.ge.s32.totalorder %s7049_s29, 2  ;;  %p166_p6 = scmp.eq.s32.totalorder %s3671_s27, 3 }
   0xc   : > { %p3674_p7 = scmp.ge.s32.totalorder %s5183_s25, 1  ;;  %p204_p9 = scmp.lt.s32.totalorder %s5183_s25, 5 }
   0xd   : > { %s7051_s29 = smov (%p32_p4, %s7049_s29), 0  ;;  %p5279_p8 = por %p166_p6, %p165_p5 }
   0xe   : > { %s144_s8 = ssub.s32 %s5179_s24, %s7051_s29  ;;  %s149_s9 = sadd.s32 1, %s5163_s20 }
   0xf   : > { %s146_s10 = sor.u32 %s145_s30, %s144_s8  ;;  %p205_p10 = pnand %p3674_p7, %p204_p9 }
  0x10   : > { %p147_p11 = scmp.eq.s32.totalorder %s146_s10, 0  ;;  %p232_p12 = scmp.lt.s32.totalorder (!%p205_p10), %s5171_s22, 1 }
  0x11   : > { %208 = sbr.rel (%p205_p10) target bundleno = 784 (0x310), region = 40  ;;  %s3677_s15 = sshll.u32 (!%p205_p10), %s5167_s21, 3 }
  0x12   : > { %s5288_s11 = scalar_select %p147_p11, %s5163_s20, %s149_s9  }
  0x13   : > { %s3678_s13 = smul.u32 (!%p205_p10), 192, %s5167_s21  ;;  %s3848_s16 = sadd.s32 (!%p205_p10), 4294967295, %s3677_s15 }
  0x14   : > { %s229_s10 = sand.u32 (!%p205_p10), 1, %s5159_s19   ;;  %s4121_s26 = sshll.u32 (!%p205_p10), %s5167_s21, 4 }
  0x15   : > { %s6825_s15 = sshll.u32 (!%p205_p10), %s229_s10, 7  ;;  %s4117_s27 = sshll.u32 (!%p205_p10), %s5171_s22, 5 }
  0x16   : > { %v4923_v0 = vld [vmem:[%s7008_s1 + $0x138] sm:$0xff]   ;;  %v4926_v3 = vld [vmem:[%s7008_s1 + $0x130] sm:$0xff]   ;;  %v4929_v6 = vld [vmem:[%s7008_s1 + $0x128] sm:$0xff]   ;;  %s233_s9 = scalar_select %p232_p12, %s5171_s22, 1  ;;  %vm454_vm0 = vcmask 1046528   ;;  %vm1956_vm7 = vcmask 1040384  }
  0x17   : > { %v4924_v1 = vld [vmem:[%s7008_s1 + $0x178] sm:$0xff]   ;;  %4122 = vmatprep.subr.bf16.mxu0 %v4923_v0  ;;  %v4927_v4 = vld [vmem:[%s7008_s1 + $0x170] sm:$0xff]   ;;  %v4930_v7 = vld [vmem:[%s7008_s1 + $0x168] sm:$0xff]   ;;  %vm303_vm1 = vsmask.f32 7424  ;;  %s3589_s21 = sadd.s32 %s4121_s26, %s4117_s27  ;;  %s6956_s8 = scalar_lea.sflag [#allocation3], %s229_s10 }
  0x18   : > { %v4925_v2 = vld [vmem:[%s7008_s1 + $0xf8] sm:$0xff]   ;;  %4644 = vmatprep.subr.bf16.mxu1 %v4924_v1  ;;  %v4928_v5 = vld [vmem:[%s7008_s1 + $0xf0] sm:$0xff]   ;;  %v4931_v8 = vld [vmem:[%s7008_s1 + $0xe8] sm:$0xff]   ;;  %s4848_s17 = smul.u32 480, %s233_s9  ;;  %s4118_s22 = sshll.u32 %s3589_s21, 7 }
  0x19   : > { %4123 = vmatpush3.bf16.msra.mxu0 %v4925_v2  ;;  %4645 = vmatpush3.bf16.msra.mxu1 %v4924_v1  ;;  %v4932_v9 = vld [vmem:[%s7008_s1 + $0x120] sm:$0xff]   ;;  %v4935_v12 = vld [vmem:[%s7008_s1 + $0x118] sm:$0xff]   ;;  %v4938_v15 = vld [vmem:[%s7008_s1 + $0x110] sm:$0xff]   ;;  %s6948_s30 = scalar_lea.hbm %s7012_s5, %s4118_s22 }
  0x1a   : > { %4124 = vmatprep.subr.bf16.mxu0 %v4926_v3  ;;  %4646 = vmatprep.subr.bf16.mxu1 %v4927_v4  ;;  %v4933_v10 = vld [vmem:[%s7008_s1 + $0x160] sm:$0xff]   ;;  %v4936_v13 = vld [vmem:[%s7008_s1 + $0x158] sm:$0xff]   ;;  %v4939_v16 = vld [vmem:[%s7008_s1 + $0x150] sm:$0xff]   ;;  %s236_s9 = scalar_lea.vmem %s7007_s0, %s4848_s17  ;;  %s5186_s17 = smov [#allocation2]  }
  0x1b   : > { %v4934_v11 = vld [vmem:[%s7008_s1 + $0xe0] sm:$0xff]   ;;  %v4937_v14 = vld [vmem:[%s7008_s1 + $0xd8] sm:$0xff]   ;;  %v4940_v17 = vld [vmem:[%s7008_s1 + $0xd0] sm:$0xff]   ;;  %s5356_s12 = scalar_lea.vmem %s236_s9, %s3678_s13 }
  0x1c   : > { %v4941_v18 = vld [vmem:[%s7008_s1 + $0x108] sm:$0xff]   ;;  %v4944_v21 = vld [vmem:[%s7008_s1 + $0x100] sm:$0xff]   ;;  %v245_v23 = vld [vmem:[%s5356_s12 + $0x18] sm:$0xff] }
  0x1d   : > { %4125 = vmatpush3.bf16.msra.mxu0 %v4928_v5  ;;  %4647 = vmatpush3.bf16.msra.mxu1 %v4927_v4  ;;  %v4942_v19 = vld [vmem:[%s7008_s1 + $0x148] sm:$0xff]   ;;  %v4945_v22 = vld [vmem:[%s7008_s1 + $0x140] sm:$0xff]   ;;  %v248_v28 = vld [vmem:[%s5356_s12 + $0x30] sm:$0xff] }
  0x1e   : > { %4126 = vmatprep.subr.bf16.mxu0 %v4929_v6  ;;  %4648 = vmatprep.subr.bf16.mxu1 %v4930_v7  ;;  %v4943_v20 = vld [vmem:[%s7008_s1 + $0xc8] sm:$0xff]   ;;  %v246_v24 = vld [vmem:[%s5356_s12 + $0x20] sm:$0xff]  ;;  %v249_v29 = vld [vmem:[%s5356_s12 + $0x38] sm:$0xff] }
  0x1f   : > { %v247_v25 = vld [vmem:[%s5356_s12 + $0x28] sm:$0x3]  ;;  %v5370_v26 = vpack.c.bf16 %v246_v24, %v245_v23  ;;  %v250_v30 = vld [vmem:[%s5356_s12 + $0x40] sm:$0x3]  ;;  %v5378_v32 = vpack.c.bf16 %v249_v29, %v248_v28  ;;  %v4947_v38 = vld [vmem:[%s7008_s1 + $0xb8] sm:$0xff]  }
  0x20   : > { %v282_v27 = vpack.c.bf16 %v247_v25, %v247_v25  ;;  %v4946_v31 = vld [vmem:[%s7008_s1 + $0xc0] sm:$0xff]   ;;  %v284_v33 = vpack.c.bf16 %v250_v30, %v250_v30  ;;  %v251_v39 = vld [vmem:[%s5356_s12 + $0x48] sm:$0xff]  ;;  %v252_v40 = vld [vmem:[%s5356_s12 + $0x50] sm:$0xff] }
  0x21   : > { %4127 = vmatpush3.bf16.msra.mxu0 %v4931_v8  ;;  %4649 = vmatpush3.bf16.msra.mxu1 %v4930_v7  ;;  %v317_v34 = vshrl.u32 %v5370_v26, 16  ;;  %v319_v35 = vshll.u32 %v5370_v26, 16  ;;  %v458_v37 = vrot.slane %v5370_v26, 1  ;;  %v461_v42 = vrot.slane %v5378_v32, 1  ;;  %v253_v45 = vld [vmem:[%s5356_s12 + $0x58] sm:$0x3] }
  0x22   : > { %4128 = vmatprep.subr.bf16.mxu0 %v4932_v9  ;;  %4650 = vmatprep.subr.bf16.mxu1 %v4933_v10  ;;  %v324_v36 = vshll.u32 %v282_v27, 16  ;;  %v459_v41 = vrot.slane %v282_v27, 1  ;;  %v462_v43 = vrot.slane %v284_v33, 1  ;;  %v329_v44 = vshrl.u32 %v5378_v32, 16  ;;  %v254_v50 = vld [vmem:[%s5356_s12 + $0x60] sm:$0xff]  ;;  %v255_v51 = vld [vmem:[%s5356_s12 + $0x68] sm:$0xff] }
  0x23   : > { %v321_v46 = vrot.slane %v319_v35, 1  ;;  %v331_v48 = vshll.u32 %v5378_v32, 16  ;;  %v336_v49 = vshll.u32 %v284_v33, 16  ;;  %v5397_v53 = vpack.c.bf16 %v252_v40, %v251_v39  ;;  %v256_v55 = vld [vmem:[%s5356_s12 + $0x70] sm:$0x3]  ;;  %v4948_v60 = vld [vmem:[%s7008_s1 + $0x78] sm:$0xff]  }
  0x24   : > { %v326_v47 = vrot.slane %v324_v36, 1  ;;  %v5395_v52 = vsel %vm454_vm0, %v458_v37, %v459_v41  ;;  %v286_v54 = vpack.c.bf16 %v253_v45, %v253_v45  ;;  %v5402_v57 = vsel %vm454_vm0, %v461_v42, %v462_v43  ;;  %v4949_v1 = vld [vmem:[%s7008_s1 + $0x38] sm:$0xff]   ;;  %v4950_v2 = vld [vmem:[%s7008_s1 + $0xb0] sm:$0xff]   ;;  %v4953_v28 = vld [vmem:[%s7008_s1 + $0x68] sm:$0xff]  }
  0x25   : > { %4129 = vmatpush3.bf16.msra.mxu0 %v4934_v11  ;;  %4651 = vmatpush3.bf16.msra.mxu1 %v4933_v10  ;;  %v322_v56 = vor.u32 %v321_v46, %v317_v34  ;;  %v333_v58 = vrot.slane %v331_v48, 1  ;;  %v338_v59 = vrot.slane %v336_v49, 1  ;;  %v464_v61 = vrot.slane %v5397_v53, 1  ;;  %v4951_v5 = vld [vmem:[%s7008_s1 + $0x70] sm:$0xff]   ;;  %v4954_v33 = vld [vmem:[%s7008_s1 + $0x28] sm:$0xff]   ;;  %v4955_v34 = vld [vmem:[%s7008_s1 + $0x60] sm:$0xff]  }
  0x26   : > { %4130 = vmatprep.subr.bf16.mxu0 %v4935_v12  ;;  %4652 = vmatprep.subr.bf16.mxu1 %v4936_v13  ;;  %v465_v62 = vrot.slane %v286_v54, 1  ;;  %v5408_v63 = vpack.c.bf16 %v255_v51, %v254_v50  ;;  %v5410_v0 = vpack.c.bf16 %v256_v55, %v256_v55  ;;  %v4952_v10 = vld [vmem:[%s7008_s1 + $0x30] sm:$0xff]   ;;  %v341_v11 = vshrl.u32 %v5397_v53, 16  ;;  %v263_v42 = vld [vmem:[%s5356_s12 + $0xa8] sm:$0xff]  ;;  %v266_v51 = vld [vmem:[%s5356_s12 + $0xc0] sm:$0xff] }
  0x27   : > { %4660 = vmatprep.mubr.bf16.mxu1 %v5395_v52  ;;  %v5419_v3 = vsel %vm303_vm1, %v322_v56, %v326_v47  ;;  %v334_v4 = vor.u32 %v333_v58, %v329_v44  ;;  %v343_v12 = vshll.u32 %v5397_v53, 16  ;;  %v4957_v44 = vld [vmem:[%s7008_s1 + $0x20] sm:$0xff]   ;;  %v264_v46 = vld [vmem:[%s5356_s12 + $0xb0] sm:$0xff]  ;;  %v265_v47 = vld [vmem:[%s5356_s12 + $0xb8] sm:$0x3] }
  0x28   : > { %787 = vmatprep.mubr.bf16.mxu0 %v5419_v3  ;;  %v5426_v6 = vsel %vm454_vm0, %v464_v61, %v465_v62  ;;  %v467_v7 = vrot.slane %v5408_v63, 1  ;;  %v468_v8 = vrot.slane %v5410_v0, 1  ;;  %v353_v35 = vshrl.u32 %v5408_v63, 16  ;;  %v268_v55 = vld [vmem:[%s5356_s12 + $0xd0] sm:$0x3] }
  0x29   : > { %4131 = vmatpush3.bf16.msra.mxu0 %v4937_v14  ;;  %4653 = vmatpush3.bf16.msra.mxu1 %v4936_v13  ;;  %v5433_v9 = vsel %vm303_vm1, %v334_v4, %v338_v59  ;;  %v348_v13 = vshll.u32 %v286_v54, 16  ;;  %v257_v14 = vld [vmem:[%s5356_s12 + $0x78] sm:$0xff]  ;;  %v355_v39 = vshll.u32 %v5408_v63, 16  ;;  %v360_v41 = vshll.u32 %v5410_v0, 16  ;;  %v267_v54 = vld [vmem:[%s5356_s12 + $0xc8] sm:$0xff] }
  0x2a   : > { %4132 = vmatprep.subr.bf16.mxu0 %v4938_v15  ;;  %4654 = vmatprep.subr.bf16.mxu1 %v4939_v16  ;;  %v258_v15 = vld [vmem:[%s5356_s12 + $0x80] sm:$0xff]  ;;  %v5460_v29 = vsel %vm454_vm0, %v467_v7, %v468_v8  ;;  %v5494_v49 = vpack.c.bf16 %v264_v46, %v263_v42  ;;  %v5496_v50 = vpack.c.bf16 %v265_v47, %v265_v47  ;;  %v4958_v59 = vld [vmem:[%s7008_s1 + $0x58] sm:$0xff]   ;;  %v4964_v42 = vld [vmem:[%s7008_s1 + $0x8] sm:$0xff]  }
  0x2b   : > { %v350_v23 = vrot.slane %v348_v13, 1  ;;  %v357_v45 = vrot.slane %v355_v39, 1  ;;  %v362_v48 = vrot.slane %v360_v41, 1  ;;  %v5510_v0 = vpack.c.bf16 %v267_v54, %v266_v51  ;;  %v4959_v7 = vld [vmem:[%s7008_s1 + $0x18] sm:$0xff]   ;;  %v4962_v13 = vld [vmem:[%s7008_s1 + $0xa0] sm:$0xff]   ;;  %v243_v54 = vld [vmem:[%s5356_s12 + $0x8] sm:$0xff] }
  0x2c   : > { %v477_v61 = vrot.slane %v5496_v50, 1 }
  0x2d   : > { %4133 = vmatpush3.bf16.msra.mxu0 %v4940_v17  ;;  %4655 = vmatpush3.bf16.msra.mxu1 %v4939_v16  ;;  %v259_v16 = vld [vmem:[%s5356_s12 + $0x88] sm:$0x3]  ;;  %v5445_v17 = vpack.c.bf16 %v258_v15, %v257_v14  ;;  %v358_v58 = vor.u32 %v357_v45, %v353_v35  ;;  %v269_v14 = vld [vmem:[%s5356_s12 + $0xd8] sm:$0xff]  ;;  %v270_v15 = vld [vmem:[%s5356_s12 + $0xe0] sm:$0xff] }
  0x2e   : > { %4134 = vmatprep.subr.bf16.mxu0 %v4941_v18  ;;  %4656 = vmatprep.subr.bf16.mxu1 %v4942_v19  ;;  %v5447_v18 = vpack.c.bf16 %v259_v16, %v259_v16  ;;  %v479_v16 = vrot.slane %v5510_v0, 1 }
  0x2f   : > { %v470_v24 = vrot.slane %v5445_v17, 1  ;;  %v367_v56 = vshll.u32 %v5445_v17, 16  ;;  %v5516_v4 = vsel %vm303_vm1, %v358_v58, %v362_v48  ;;  %v242_v48 = vld [vmem:[%s5356_s12] sm:$0xff] }
  0x30   : > { %v471_v25 = vrot.slane %v5447_v18, 1  ;;  %v5584_v58 = vpack.c.bf16 %v243_v54, %v242_v48 }
  0x31   : > { %4135 = vmatpush3.bf16.msra.mxu0 %v4943_v20  ;;  %4657 = vmatpush3.bf16.msra.mxu1 %v4942_v19  ;;  %v260_v19 = vld [vmem:[%s5356_s12 + $0x90] sm:$0xff]  ;;  %v261_v20 = vld [vmem:[%s5356_s12 + $0x98] sm:$0xff]  ;;  %v369_v8 = vrot.slane %v367_v56, 1 }
  0x32   : > { %4136 = vmatprep.subr.bf16.mxu0 %v4944_v21  ;;  %4658 = vmatprep.subr.bf16.mxu1 %v4945_v22  ;;  %v262_v21 = vld [vmem:[%s5356_s12 + $0xa0] sm:$0x3]  ;;  %v5454_v27 = vpack.c.bf16 %v261_v20, %v260_v19  ;;  %v5472_v36 = vsel %vm454_vm0, %v470_v24, %v471_v25  ;;  %v271_v20 = vld [vmem:[%s5356_s12 + $0xe8] sm:$0x3] }
  0x33   : > { %v5547_v25 = vpack.c.bf16 %v271_v20, %v271_v20 }
  0x34   : > { %v473_v40 = vrot.slane %v5454_v27, 1 }
  0x35   : > { %4137 = vmatpush3.bf16.msra.mxu0 %v4946_v31  ;;  %4659 = vmatpush3.bf16.msra.mxu1 %v4945_v22  ;;  %v345_v22 = vrot.slane %v343_v12, 1  ;;  %v5462_v31 = vpack.c.bf16 %v262_v21, %v262_v21  ;;  %v4961_v12 = vld [vmem:[%s7008_s1 + $0x10] sm:$0xff]   ;;  %v5543_v21 = vpack.c.bf16 %v270_v15, %v269_v14  ;;  %v483_v39 = vrot.slane %v5547_v25, 1 }
  0x36   : > { %4680 = vmatprep.subr.bf16.mxu0 %v4947_v38  ;;  %4216 = vmatprep.subr.bf16.mxu1 %v4948_v60  ;;  %v476_v60 = vrot.slane %v5494_v49, 1 }
  0x37   : > { %v346_v30 = vor.u32 %v345_v22, %v341_v11  ;;  %v474_v43 = vrot.slane %v5462_v31, 1  ;;  %v372_v11 = vshll.u32 %v5447_v18, 16  ;;  %v272_v22 = vld [vmem:[%s5356_s12 + $0xf0] sm:$0xff]  ;;  %v415_v48 = vshll.u32 %v5543_v21, 16 }
  0x38   : > { %788 = vmatmul.mubr.bf16.vlgmr.msra.gmra.mxu0 %v5370_v26  ;;  %4661 = vmatmul.mubr.bf16.vlgmr.msra.gmra.mxu1 %v5402_v57  ;;  %v413_v54 = vshrl.u32 %v5543_v21, 16 }
  0x39   : > { %4681 = vmatpush3.bf16.msra.mxu0 %v4947_v38  ;;  %795 = vmatprep.mubr.bf16.mxu0 %v5433_v9  ;;  %v5475_v37 = vsel %vm303_vm1, %v346_v30, %v350_v23  ;;  %v4956_v38 = vld [vmem:[%s7008_s1 + $0xa8] sm:$0xff]   ;;  %v5508_v62 = vsel %vm454_vm0, %v473_v40, %v474_v43  ;;  %v273_v23 = vld [vmem:[%s5356_s12 + $0xf8] sm:$0xff]  ;;  %v374_v24 = vrot.slane %v372_v11, 1  ;;  %v384_v40 = vshll.u32 %v5462_v31, 16  ;;  %v4965_v31 = vld [vmem:[%s7008_s1 + $0x40] sm:$0xff]  }
  0x3a   : > { %4664 = vmatprep.mubr.bf16.mxu1 %v5426_v6  ;;  %4217 = vmatpush3.bf16.msra.mxu1 %v4949_v1  ;;  %v5512_v1 = vpack.c.bf16 %v268_v55, %v268_v55  ;;  %v5550_v30 = vpack.c.bf16 %v273_v23, %v272_v22  ;;  %v377_v43 = vshrl.u32 %v5454_v27, 16  ;;  %v244_v55 = vld [vmem:[%s5356_s12 + $0x10] sm:$0x3]  ;;  %v307_v11 = vshll.u32 %v5584_v58, 16 }
  0x3b   : > { %4682 = vmatprep.subr.bf16.mxu0 %v4950_v2  ;;  %4218 = vmatprep.subr.bf16.mxu1 %v4951_v5  ;;  %v5519_v5 = vsel %vm454_vm0, %v476_v60, %v477_v61  ;;  %v386_v56 = vrot.slane %v384_v40, 1  ;;  %v4967_v60 = vld [vmem:[%s7008_s1 + $0x98] sm:$0xff]   ;;  %v391_v61 = vshll.u32 %v5494_v49, 16  ;;  %v396_v23 = vshll.u32 %v5496_v50, 16 }
  0x3c   : > { %v480_v18 = vrot.slane %v5512_v1, 1  ;;  %v558_v46 = vrot.slane %v5550_v30, 1  ;;  %v309_v14 = vrot.slane %v307_v11, 1  ;;  %v408_v40 = vshll.u32 %v5512_v1, 16 }
  0x3d   : > { %4683 = vmatpush3.bf16.msra.mxu0 %v4950_v2  ;;  %v365_v2 = vshrl.u32 %v5445_v17, 16  ;;  %v393_v22 = vrot.slane %v391_v61, 1 }
  0x3e   : > { %4219 = vmatpush3.bf16.msra.mxu1 %v4952_v10  ;;  %4684 = vmatprep.subr.bf16.mxu0 %v4956_v38  ;;  %v4960_v10 = vld [vmem:[%s7008_s1 + $0x50] sm:$0xff]   ;;  %v5562_v41 = vsel %vm454_vm0, %v479_v16, %v480_v18  ;;  %v389_v18 = vshrl.u32 %v5494_v49, 16 }
  0x3f   : > { %4220 = vmatprep.subr.bf16.mxu1 %v4953_v28  ;;  %v370_v19 = vor.u32 %v369_v8, %v365_v2  ;;  %v274_v28 = vld [vmem:[%s5356_s12 + $0x100] sm:$0x3]  ;;  %v4968_v2 = vld [vmem:[%s7008_s1 + $0x90] sm:$0xff]  }
  0x40   : > { %796 = vmatmul.mubr.bf16.gmra.mxu0 %v5378_v32  ;;  %4665 = vmatmul.mubr.bf16.gmra.mxu1 %v5460_v29  ;;  %v5554_v35 = vpack.c.bf16 %v274_v28, %v274_v28  ;;  %v394_v50 = vor.u32 %v393_v22, %v389_v18 }
  0x41   : > { %803 = vmatprep.mubr.bf16.mxu0 %v5475_v37  ;;  %4668 = vmatprep.mubr.bf16.mxu1 %v5472_v36 }
  0x42   : > { %4221 = vmatpush3.bf16.msra.mxu1 %v4954_v33  ;;  %4685 = vmatpush3.bf16.msra.mxu0 %v4956_v38  ;;  %v379_v33 = vshll.u32 %v5454_v27, 16  ;;  %v4963_v38 = vld [vmem:[%s7008_s1 + $0x48] sm:$0xff]   ;;  %v559_v51 = vrot.slane %v5554_v35, 1  ;;  %v551_v11 = vshll.u32 %v5554_v35, 16 }
  0x43   : > { %4222 = vmatprep.subr.bf16.mxu1 %v4955_v34  ;;  %4686 = vmatprep.subr.bf16.mxu0 %v4962_v13  ;;  %v482_v34 = vrot.slane %v5543_v21, 1  ;;  %v4990_v35 = vld [vmem:[%s7008_s1 + $0x208] sm:$0xff]  }
  0x44   : > { %v381_v47 = vrot.slane %v379_v33, 1  ;;  %v5607_v16 = vsel %vm454_vm0, %v558_v46, %v559_v51  ;;  %v4972_v33 = vld [vmem:[%s7008_s1 + $0x80] sm:$0xff]   ;;  %v4974_v46 = vld [vmem:[%s7008_s1 + $0x1f8] sm:$0xff]   ;;  %v4973_v51 = vld [vmem:[%s7008_s1 + $0x228] sm:$0xff]  }
  0x45   : > { %v5572_v45 = vsel %vm454_vm0, %v482_v34, %v483_v39  ;;  %v398_v34 = vrot.slane %v396_v23, 1  ;;  %v401_v39 = vshrl.u32 %v5510_v0, 16  ;;  %v4977_v23 = vld [vmem:[%s7008_s1 + $0x1f0] sm:$0xff]  }
  0x46   : > { %4223 = vmatpush3.bf16.msra.mxu1 %v4957_v44  ;;  %4687 = vmatpush3.bf16.msra.mxu0 %v4962_v13  ;;  %v5569_v44 = vsel %vm303_vm1, %v370_v19, %v374_v24  ;;  %v382_v8 = vor.u32 %v381_v47, %v377_v43  ;;  %v4969_v13 = vld [vmem:[%s7008_s1 + $0x238] sm:$0xff]   ;;  %v4970_v24 = vld [vmem:[%s7008_s1 + $0x88] sm:$0xff]   ;;  %v410_v47 = vrot.slane %v408_v40, 1  ;;  %v4988_v40 = vld [vmem:[%s7008_s1 + $0x190] sm:$0xff]  }
  0x47   : > { %4224 = vmatprep.subr.bf16.mxu1 %v4958_v59  ;;  %v5586_v59 = vpack.c.bf16 %v244_v55, %v244_v55  ;;  %4688 = vmatprep.subr.bf16.mxu0 %v4967_v60 }
  0x48   : > { %804 = vmatmul.mubr.bf16.gmra.mxu0 %v5397_v53  ;;  %4669 = vmatmul.mubr.bf16.gmra.mxu1 %v5508_v62  ;;  %v5611_v19 = vsel %vm303_vm1, %v382_v8, %v386_v56  ;;  %v417_v56 = vrot.slane %v415_v48, 1 }
  0x49   : > { %811 = vmatprep.mubr.bf16.mxu0 %v5516_v4  ;;  %4672 = vmatprep.mubr.bf16.mxu1 %v5519_v5  ;;  %v456_v18 = vrot.slane %v5586_v59, 1 }
  0x4a   : > { %4225 = vmatpush3.bf16.msra.mxu1 %v4959_v7  ;;  %v4966_v7 = vld [vmem:[%s7008_s1] sm:$0xff]   ;;  %4689 = vmatpush3.bf16.msra.mxu0 %v4967_v60  ;;  %v418_v61 = vor.u32 %v417_v56, %v413_v54  ;;  %v5001_v56 = vld [vmem:[%s7010_s3 + $0x128] sm:$0xff]  }
  0x4b   : > { %4226 = vmatprep.subr.bf16.mxu1 %v4960_v10  ;;  %v305_v10 = vshrl.u32 %v5584_v58, 16  ;;  %4690 = vmatprep.subr.bf16.mxu0 %v4968_v2  ;;  %v4975_v60 = vld [vmem:[%s7008_s1 + $0x220] sm:$0xff]  }
  0x4d   : > { %v310_v20 = vor.u32 %v309_v14, %v305_v10  ;;  %v544_v10 = vshrl.u32 %v5550_v30, 16  ;;  %v553_v14 = vrot.slane %v551_v11, 1  ;;  %v5005_v11 = vld [vmem:[%s7010_s3 + $0xe0] sm:$0xff]  }
  0x4e   : > { %4227 = vmatpush3.bf16.msra.mxu1 %v4961_v12  ;;  %v312_v12 = vshll.u32 %v5586_v59, 16  ;;  %4691 = vmatpush3.bf16.msra.mxu0 %v4968_v2  ;;  %v4976_v59 = vld [vmem:[%s7008_s1 + $0x1b8] sm:$0xff]  }
  0x4f   : > { %4228 = vmatprep.subr.bf16.mxu1 %v4963_v38  ;;  %v403_v38 = vshll.u32 %v5510_v0, 16  ;;  %4692 = vmatprep.subr.bf16.mxu0 %v4970_v24 }
  0x50   : > { %812 = vmatmul.mubr.bf16.gmra.mxu0 %v5408_v63  ;;  %4673 = vmatmul.mubr.bf16.gmra.mxu1 %v5562_v41  ;;  %v314_v15 = vrot.slane %v312_v12, 1  ;;  %v4985_v12 = vld [vmem:[%s7008_s1 + $0x210] sm:$0xff]  }
  0x51   : > { %819 = vmatprep.mubr.bf16.mxu0 %v5569_v44  ;;  %4676 = vmatprep.mubr.bf16.mxu1 %v5572_v45  ;;  %v405_v43 = vrot.slane %v403_v38, 1  ;;  %v4986_v38 = vld [vmem:[%s7008_s1 + $0x198] sm:$0xff]  }
  0x52   : > { %4229 = vmatpush3.bf16.msra.mxu1 %v4964_v42  ;;  %v315_v28 = vsel %vm303_vm1, %v310_v20, %v314_v15  ;;  %4693 = vmatpush3.bf16.msra.mxu0 %v4970_v24  ;;  %v5628_v42 = vsel %vm303_vm1, %v394_v50, %v398_v34  ;;  %v455_v15 = vrot.slane %v5584_v58, 1  ;;  %v4994_v20 = vld [vmem:[%s7008_s1 + $0x200] sm:$0xff]   ;;  %v4978_v24 = vld [vmem:[%s7008_s1 + $0x1b0] sm:$0xff]   ;;  %v4984_v34 = vld [vmem:[%s7008_s1 + $0x1d8] sm:$0xff]  }
  0x53   : > { %4230 = vmatprep.subr.bf16.mxu1 %v4965_v31  ;;  %4694 = vmatprep.subr.bf16.mxu0 %v4972_v33  ;;  %v4971_v31 = vld [vmem:[%s7008_s1 + $0x230] sm:$0xff]   ;;  %v406_v1 = vor.u32 %v405_v43, %v401_v39  ;;  %v4982_v50 = vld [vmem:[%s7008_s1 + $0x1e0] sm:$0xff]   ;;  %v4989_v43 = vld [vmem:[%s7008_s1 + $0x1c8] sm:$0xff]  }
  0x54   : > { %v4987_v39 = vld [vmem:[%s7008_s1 + $0x1d0] sm:$0xff]  }
  0x55   : > { %v5646_v55 = vsel %vm303_vm1, %v406_v1, %v410_v47  ;;  %v4993_v1 = vld [vmem:[%s7008_s1 + $0x180] sm:$0xff]   ;;  %v5000_v47 = vld [vmem:[%s7010_s3 + $0xf0] sm:$0xff]  }
  0x56   : > { %4231 = vmatpush3.bf16.msra.mxu1 %v4966_v7  ;;  %4695 = vmatpush3.bf16.msra.mxu0 %v4972_v33  ;;  %v546_v7 = vshll.u32 %v5550_v30, 16  ;;  %v4981_v33 = vld [vmem:[%s7008_s1 + $0x1a8] sm:$0xff]  }
  0x57   : > { %4716 = vmatprep.subr.bf16.mxu1 %v4969_v13  ;;  %4310 = vmatprep.subr.bf16.mxu0 %v4974_v46  ;;  %v4991_v46 = vld [vmem:[%s7008_s1 + $0x188] sm:$0xff]  }
  0x58   : > { %820 = vmatmul.mubr.bf16.gmra.mxu0 %v5445_v17  ;;  %4677 = vmatmul.mubr.bf16.gmra.mxu1 %v5607_v16 }
  0x59   : > { %827 = vmatprep.mubr.bf16.mxu0 %v5611_v19  ;;  %1157 = vmatprep.mubr.bf16.mxu1 %v315_v28  ;;  %v4979_v28 = vld [vmem:[%s7008_s1 + $0x1e8] sm:$0xff]  }
  0x60   : > { %828 = vmatmul.mubr.bf16.gmra.mxu0 %v5454_v27  ;;  %1158 = vmatmul.mubr.bf16.vlgmr.msra.gmra.mxu1 %v5584_v58  ;;  %v457_v58 = vsel %vm454_vm0, %v455_v15, %v456_v18  ;;  %v5006_v18 = vld [vmem:[%s7010_s3 + $0x118] sm:$0xff]  }
  0x61   : > { %835 = vmatprep.mubr.bf16.mxu0 %v5628_v42  ;;  %1165 = vmatprep.mubr.bf16.mxu1 %v5419_v3  ;;  %v420_v3 = vshll.u32 %v5547_v25, 16  ;;  %v4980_v25 = vld [vmem:[%s7008_s1 + $0x218] sm:$0xff]  }
  0x62   : > { %4717 = vmatpush3.bf16.msra.mxu1 %v4969_v13 }
  0x63   : > { %4718 = vmatprep.subr.bf16.mxu1 %v4971_v31  ;;  %v422_v2 = vrot.slane %v420_v3, 1 }
  0x65   : > { %v5661_v8 = vsel %vm303_vm1, %v418_v61, %v422_v2  ;;  %v5003_v61 = vld [vmem:[%s7010_s3 + $0xe8] sm:$0xff]  }
  0x66   : > { %4719 = vmatpush3.bf16.msra.mxu1 %v4971_v31  ;;  %v4992_v31 = vld [vmem:[%s7008_s1 + $0x1c0] sm:$0xff]  }
  0x67   : > { %4720 = vmatprep.subr.bf16.mxu1 %v4973_v51 }
  0x68   : > { %836 = vmatmul.mubr.bf16.gmra.mxu0 %v5494_v49  ;;  %1166 = vmatmul.mubr.bf16.gmra.mxu1 %v5370_v26  ;;  %v548_v26 = vrot.slane %v546_v7, 1 }
  0x69   : > { %843 = vmatprep.mubr.bf16.mxu0 %v5646_v55  ;;  %1173 = vmatprep.mubr.bf16.mxu1 %v5433_v9 }
  0x6a   : > { %4721 = vmatpush3.bf16.msra.mxu1 %v4973_v51  ;;  %v549_v13 = vor.u32 %v548_v26, %v544_v10 }
  0x6b   : > { %4722 = vmatprep.subr.bf16.mxu1 %v4975_v60 }
  0x6c   : > { %v5681_v22 = vsel %vm303_vm1, %v549_v13, %v553_v14 }
  0x6e   : > { %4723 = vmatpush3.bf16.msra.mxu1 %v4975_v60 }
  0x6f   : > { %4724 = vmatprep.subr.bf16.mxu1 %v4980_v25 }
  0x70   : > { %844 = vmatmul.mubr.bf16.gmra.mxu0 %v5510_v0  ;;  %1174 = vmatmul.mubr.bf16.gmra.mxu1 %v5378_v32 }
  0x71   : > { %851 = vmatprep.mubr.bf16.mxu0 %v5661_v8  ;;  %1181 = vmatprep.mubr.bf16.mxu1 %v5475_v37 }
  0x72   : > { %4725 = vmatpush3.bf16.msra.mxu1 %v4980_v25  ;;  %v5002_v25 = vld [vmem:[%s7010_s3 + $0x168] sm:$0xff]  }
  0x73   : > { %4726 = vmatprep.subr.bf16.mxu1 %v4985_v12 }
  0x76   : > { %4727 = vmatpush3.bf16.msra.mxu1 %v4985_v12 }
  0x77   : > { %4728 = vmatprep.subr.bf16.mxu1 %v4990_v35 }
  0x78   : > { %852 = vmatmul.mubr.bf16.gmra.mxu0 %v5543_v21  ;;  %1182 = vmatmul.mubr.bf16.gmra.mxu1 %v5397_v53 }
  0x79   : > { %859 = vmatprep.mubr.bf16.mxu0 %v5681_v22  ;;  %1189 = vmatprep.mubr.bf16.mxu1 %v5516_v4 }
  0x7a   : > { %4729 = vmatpush3.bf16.msra.mxu1 %v4990_v35  ;;  %v5007_v35 = vld [vmem:[%s7010_s3 + $0x160] sm:$0xff]  }
  0x7b   : > { %4730 = vmatprep.subr.bf16.mxu1 %v4994_v20 }
  0x7e   : > { %4731 = vmatpush3.bf16.msra.mxu1 %v4994_v20 }
  0x80   : > { %860 = vmatmul.mubr.bf16.gmra.mxu0 %v5550_v30  ;;  %1190 = vmatmul.mubr.bf16.gmra.mxu1 %v5408_v63 }
  0x81   : > { %1197 = vmatprep.mubr.bf16.mxu1 %v5569_v44  ;;  %4696 = vmatprep.mubr.bf16.mxu0 %v457_v58  ;;  %v5008_v58 = vld [vmem:[%s7010_s3 + $0xd8] sm:$0xff]  }
  0x88   : > { %1198 = vmatmul.mubr.bf16.gmra.mxu1 %v5445_v17  ;;  %4697 = vmatmul.mubr.bf16.vlgmr.msra.gmra.mxu0 %v5395_v52  ;;  %v4983_v52 = vld [vmem:[%s7008_s1 + $0x1a0] sm:$0xff]  }
  0x89   : > { %4311 = vmatpush3.bf16.msra.mxu0 %v4976_v59  ;;  %1205 = vmatprep.mubr.bf16.mxu1 %v5611_v19 }
  0x8a   : > { %4312 = vmatprep.subr.bf16.mxu0 %v4977_v23  ;;  %4700 = vmatprep.mubr.bf16.mxu0 %v5402_v57 }
  0x8d   : > { %4313 = vmatpush3.bf16.msra.mxu0 %v4978_v24 }
  0x8e   : > { %4314 = vmatprep.subr.bf16.mxu0 %v4979_v28  ;;  %v5011_v28 = vld [vmem:[%s7010_s3 + $0x158] sm:$0xff]  }
  0x90   : > { %1206 = vmatmul.mubr.bf16.gmra.mxu1 %v5454_v27  ;;  %4701 = vmatmul.mubr.bf16.gmra.mxu0 %v5426_v6 }
  0x91   : > { %4315 = vmatpush3.bf16.msra.mxu0 %v4981_v33  ;;  %1213 = vmatprep.mubr.bf16.mxu1 %v5628_v42 }
  0x92   : > { %4704 = vmatprep.mubr.bf16.mxu0 %v5460_v29  ;;  %4316 = vmatprep.subr.bf16.mxu0 %v4982_v50  ;;  %v5009_v50 = vld [vmem:[%s7010_s3 + $0x110] sm:$0xff]  }
  0x95   : > { %4317 = vmatpush3.bf16.msra.mxu0 %v4983_v52 }
  0x96   : > { %4318 = vmatprep.subr.bf16.mxu0 %v4984_v34 }
  0x98   : > { %1214 = vmatmul.mubr.bf16.gmra.mxu1 %v5494_v49  ;;  %4705 = vmatmul.mubr.bf16.gmra.mxu0 %v5472_v36 }
  0x99   : > { %4319 = vmatpush3.bf16.msra.mxu0 %v4986_v38  ;;  %1221 = vmatprep.mubr.bf16.mxu1 %v5646_v55  ;;  %v5010_v38 = vld [vmem:[%s7010_s3 + $0xd0] sm:$0xff]  }
  0x9a   : > { %4708 = vmatprep.mubr.bf16.mxu0 %v5508_v62  ;;  %4320 = vmatprep.subr.bf16.mxu0 %v4987_v39 }
  0x9d   : > { %4321 = vmatpush3.bf16.msra.mxu0 %v4988_v40 }
  0x9e   : > { %4322 = vmatprep.subr.bf16.mxu0 %v4989_v43 }
  0xa0   : > { %1222 = vmatmul.mubr.bf16.gmra.mxu1 %v5510_v0  ;;  %4709 = vmatmul.mubr.bf16.gmra.mxu0 %v5519_v5 }
  0xa1   : > { %1229 = vmatprep.mubr.bf16.mxu1 %v5661_v8  ;;  %4712 = vmatprep.mubr.bf16.mxu0 %v5562_v41 }
  0xa2   : > { %4323 = vmatpush3.bf16.msra.mxu0 %v4991_v46  ;;  %v5014_v46 = vld [vmem:[%s7010_s3 + $0x150] sm:$0xff]  }
  0xa3   : > { %4324 = vmatprep.subr.bf16.mxu0 %v4992_v31 }
  0xa6   : > { %4325 = vmatpush3.bf16.msra.mxu0 %v4993_v1  ;;  %v5012_v1 = vld [vmem:[%s7010_s3 + $0x108] sm:$0xff]  }
  0xa8   : > { %1230 = vmatmul.mubr.bf16.gmra.mxu1 %v5543_v21  ;;  %4713 = vmatmul.mubr.bf16.gmra.mxu0 %v5572_v45 }
  0xa9   : > { %1595 = vmatprep.mubr.bf16.mxu0 %v5433_v9  ;;  %4732 = vmatprep.mubr.bf16.mxu1 %v5402_v57  ;;  %v276_v57 = vld [vmem:[%s5356_s12 + $0x110] sm:$0xff] }
  0xb0   : > { %1596 = vmatmul.mubr.bf16.vlgmr.msra.gmra.mxu0 %v5378_v32  ;;  %4733 = vmatmul.mubr.bf16.vlgmr.msra.gmra.mxu1 %v5426_v6  ;;  %v275_v32 = vld [vmem:[%s5356_s12 + $0x108] sm:$0xff]  ;;  %v277_v6 = vld [vmem:[%s5356_s12 + $0x118] sm:$0x3] }
  0xb1   : > { %1603 = vmatprep.mubr.bf16.mxu0 %v5475_v37  ;;  %4736 = vmatprep.mubr.bf16.mxu1 %v5460_v29  ;;  %v301_v9 = vpack.c.bf16 %v276_v57, %v275_v32  ;;  %v302_v29 = vpack.c.bf16 %v277_v6, %v277_v6  ;;  %v4995_v37 = vld [vmem:[%s7010_s3 + $0x178] sm:$0xff]   ;;  %v5013_v6 = vld [vmem:[%s7010_s3 + $0xc8] sm:$0xff]  }
  0xb2   : > { %4752 = vmatprep.subr.bf16.mxu0 %v4995_v37 }
  0xb3   : > { %4753 = vmatpush3.bf16.msra.mxu0 %v4995_v37 }
  0xb8   : > { %1604 = vmatmul.mubr.bf16.gmra.mxu0 %v5397_v53  ;;  %4737 = vmatmul.mubr.bf16.gmra.mxu1 %v5472_v36  ;;  %v1366_v53 = vrot.slane %v301_v9, 1 }
  0xb9   : > { %1611 = vmatprep.mubr.bf16.mxu0 %v5516_v4  ;;  %4740 = vmatprep.mubr.bf16.mxu1 %v5508_v62  ;;  %v1352_v62 = vshrl.u32 %v301_v9, 16 }
  0xc0   : > { %1612 = vmatmul.mubr.bf16.gmra.mxu0 %v5408_v63  ;;  %4741 = vmatmul.mubr.bf16.gmra.mxu1 %v5519_v5  ;;  %v1367_v63 = vrot.slane %v302_v29, 1  ;;  %v1359_v5 = vshll.u32 %v302_v29, 16 }
  0xc1   : > { %1619 = vmatprep.mubr.bf16.mxu0 %v5569_v44  ;;  %4744 = vmatprep.mubr.bf16.mxu1 %v5562_v41  ;;  %v4996_v41 = vld [vmem:[%s7010_s3 + $0x138] sm:$0xff]   ;;  %v4997_v44 = vld [vmem:[%s7010_s3 + $0x170] sm:$0xff]  }
  0xc2   : > { %v1368_v36 = vsel %vm454_vm0, %v1366_v53, %v1367_v63  ;;  %4404 = vmatprep.subr.bf16.mxu1 %v4996_v41  ;;  %4754 = vmatprep.subr.bf16.mxu0 %v4997_v44  ;;  %v5016_v53 = vld [vmem:[%s7010_s3 + $0x148] sm:$0xff]   ;;  %v5015_v63 = vld [vmem:[%s7010_s3 + $0x100] sm:$0xff]  }
  0xc3   : > { %4755 = vmatpush3.bf16.msra.mxu0 %v4997_v44  ;;  %v5018_v41 = vld [vmem:[%s7010_s3 + $0x140] sm:$0xff]  }
  0xc4   : > { %4756 = vmatprep.subr.bf16.mxu0 %v5002_v25 }
  0xc7   : > { %4757 = vmatpush3.bf16.msra.mxu0 %v5002_v25 }
  0xc8   : > { %1620 = vmatmul.mubr.bf16.gmra.mxu0 %v5445_v17  ;;  %4745 = vmatmul.mubr.bf16.gmra.mxu1 %v5572_v45  ;;  %v1354_v17 = vshll.u32 %v301_v9, 16 }
  0xc9   : > { %1627 = vmatprep.mubr.bf16.mxu0 %v5611_v19  ;;  %4748 = vmatprep.mubr.bf16.mxu1 %v5607_v16 }
  0xca   : > { %v1356_v4 = vrot.slane %v1354_v17, 1  ;;  %4758 = vmatprep.subr.bf16.mxu0 %v5007_v35 }
  0xcb   : > { %4759 = vmatpush3.bf16.msra.mxu0 %v5007_v35 }
  0xcc   : > { %4760 = vmatprep.subr.bf16.mxu0 %v5011_v28 }
  0xcf   : > { %4761 = vmatpush3.bf16.msra.mxu0 %v5011_v28 }
  0xd0   : > { %1628 = vmatmul.mubr.bf16.gmra.mxu0 %v5454_v27  ;;  %4749 = vmatmul.mubr.bf16.gmra.mxu1 %v1368_v36  ;;  %v1357_v27 = vor.u32 %v1356_v4, %v1352_v62  ;;  %v5017_v62 = vld [vmem:[%s7010_s3 + $0xc0] sm:$0xff]  }
  0xd1   : > { %1635 = vmatprep.mubr.bf16.mxu0 %v5628_v42  ;;  %4762 = vmatprep.subr.bf16.mxu0 %v5014_v46 }
  0xd3   : > { %4763 = vmatpush3.bf16.msra.mxu0 %v5014_v46 }
  0xd4   : > { %4764 = vmatprep.subr.bf16.mxu0 %v5016_v53 }
  0xd7   : > { %4765 = vmatpush3.bf16.msra.mxu0 %v5016_v53 }
  0xd8   : > { %1636 = vmatmul.mubr.bf16.gmra.mxu0 %v5494_v49  ;;  %v1361_v49 = vrot.slane %v1359_v5, 1  ;;  %4766 = vmatprep.subr.bf16.mxu0 %v5018_v41 }
  0xd9   : > { %1643 = vmatprep.mubr.bf16.mxu0 %v5646_v55 }
  0xdb   : > { %4767 = vmatpush3.bf16.msra.mxu0 %v5018_v41 }
  0xe0   : > { %1644 = vmatmul.mubr.bf16.gmra.mxu0 %v5510_v0  ;;  %v1362_v0 = vsel %vm303_vm1, %v1357_v27, %v1361_v49 }
  0xe1   : > { %1651 = vmatprep.mubr.bf16.mxu0 %v5661_v8  ;;  %v5004_v8 = vld [vmem:[%s7010_s3 + $0x120] sm:$0xff]  }
  0xe8   : > { %1652 = vmatmul.mubr.bf16.gmra.mxu0 %v5543_v21  ;;  %v4998_v21 = vld [vmem:[%s7010_s3 + $0xf8] sm:$0xff]  }
  0xe9   : > { %1659 = vmatprep.mubr.bf16.mxu0 %v5681_v22  ;;  %4405 = vmatpush3.bf16.msra.mxu1 %v4998_v21 }
  0xf0   : > { %1660 = vmatmul.mubr.bf16.gmra.mxu0 %v5550_v30  ;;  %v4999_v30 = vld [vmem:[%s7010_s3 + $0x130] sm:$0xff]  }
  0xf1   : > { %1667 = vmatprep.mubr.bf16.mxu0 %v1362_v0  ;;  %4406 = vmatprep.subr.bf16.mxu1 %v4999_v30 }
  0xf2   : > { %4407 = vmatpush3.bf16.msra.mxu1 %v5000_v47 }
  0xf3   : > { %4408 = vmatprep.subr.bf16.mxu1 %v5001_v56 }
  0xf6   : > { %4409 = vmatpush3.bf16.msra.mxu1 %v5003_v61 }
  0xf7   : > { %4410 = vmatprep.subr.bf16.mxu1 %v5004_v8 }
  0xf8   : > { %v4138_v45 = vpop.f32.mrf.mxu0  ;;  %v4662_v16 = vpop.f32.mrf.mxu1  ;;  %1668 = vmatmul.mubr.bf16.gmra.mxu0 %v301_v9 }
  0xfa   : > { %v4139_v19 = vpop.f32.mrf.mxu0  ;;  %v902_v42 = vpop.f32.mrf.mxu1  ;;  %4411 = vmatpush3.bf16.msra.mxu1 %v5005_v11 }
  0xfb   : > { %v4140_v48 = vadd.f32 %v4139_v19, %v4138_v45  ;;  %4412 = vmatprep.subr.bf16.mxu1 %v5006_v18 }
  0xfc   : > { %v5804_v51 = vpop.f32.mrf.mxu0  ;;  %v4663_v54 = vpop.f32.mrf.mxu1 }
  0xfd   : > { %v5806_v55 = vadd.f32 %v4140_v48, %v902_v42 }
  0xfe   : > { %v5811_v3 = vpop.f32.mrf.mxu0  ;;  %v5813_v60 = vpop.f32.mrf.mxu1  ;;  %4413 = vmatpush3.bf16.msra.mxu1 %v5008_v58 }
  0xff   : > { %4414 = vmatprep.subr.bf16.mxu1 %v5009_v50 }
 0x100   : > { %v4144_v2 = vpop.f32.mrf.mxu0  ;;  %v5818_v7 = vpop.f32.mrf.mxu1 }
 0x102   : > { %v4145_v10 = vpop.f32.mrf.mxu0  ;;  %v918_v26 = vpop.f32.mrf.mxu1  ;;  %4415 = vmatpush3.bf16.msra.mxu1 %v5010_v38 }
 0x103   : > { %v4146_v12 = vadd.f32 %v4145_v10, %v4144_v2  ;;  %4416 = vmatprep.subr.bf16.mxu1 %v5012_v1  ;;  %v5019_v10 = vld [vmem:[%s7010_s3 + $0x78] sm:$0xff]  }
 0x104   : > { %v4147_v13 = vpop.f32.mrf.mxu0  ;;  %v4667_v14 = vpop.f32.mrf.mxu1 }
 0x105   : > { %v5832_v15 = vadd.f32 %v4662_v16, %v4146_v12 }
 0x106   : > { %v4148_v20 = vpop.f32.mrf.mxu0  ;;  %v5837_v22 = vpop.f32.mrf.mxu1  ;;  %4417 = vmatpush3.bf16.msra.mxu1 %v5013_v6 }
 0x107   : > { %v4149_v59 = vadd.f32 %v4148_v20, %v4147_v13  ;;  %4418 = vmatprep.subr.bf16.mxu1 %v5015_v63 }
 0x108   : > { %v4150_v23 = vpop.f32.mrf.mxu0  ;;  %v5842_v24 = vpop.f32.mrf.mxu1 }
 0x109   : > { %v5847_v33 = vadd.f32 %v4663_v54, %v4149_v59 }
 0x10a   : > { %v4151_v52 = vpop.f32.mrf.mxu0  ;;  %v934_v34 = vpop.f32.mrf.mxu1  ;;  %4419 = vmatpush3.bf16.msra.mxu1 %v5017_v62 }
 0x10b   : > { %v4152_v39 = vadd.f32 %v4151_v52, %v4150_v23  ;;  %4484 = vmatprep.subr.bf16.mxu1 %v5019_v10 }
 0x10c   : > { %v5855_v40 = vpop.f32.mrf.mxu0  ;;  %v5857_v43 = vpop.f32.mrf.mxu1 }
 0x10d   : > { %v5862_v31 = vadd.f32 %v4152_v39, %v918_v26  ;;  %v4143_v26 = vadd.f32 %v5811_v3, %v5804_v51 }
 0x10e   : > { %v5867_v32 = vpop.f32.mrf.mxu0  ;;  %v5869_v57 = vpop.f32.mrf.mxu1 }
 0x10f   : > { %v906_v59 = vadd.f32 %v4143_v26, %v5813_v60 }
 0x110   : > { %v4156_v9 = vpop.f32.mrf.mxu0  ;;  %v5874_v29 = vpop.f32.mrf.mxu1 }
 0x112   : > { %v4157_v36 = vpop.f32.mrf.mxu0  ;;  %v950_v17 = vpop.f32.mrf.mxu1 }
 0x113   : > { %v4158_v37 = vadd.f32 %v4157_v36, %v4156_v9 }
 0x114   : > { %v4159_v4 = vpop.f32.mrf.mxu0  ;;  %v5885_v5 = vpop.f32.mrf.mxu1 }
 0x115   : > { %v5888_v27 = vadd.f32 %v5818_v7, %v4158_v37 }
 0x116   : > { %v4160_v49 = vpop.f32.mrf.mxu0  ;;  %v5890_v0 = vpop.f32.mrf.mxu1 }
 0x117   : > { %v4161_v44 = vadd.f32 %v4160_v49, %v4159_v4  ;;  %v5943_v4 = vld [vmem:[%s7010_s3 + $0xb8] sm:$0xff]  }
 0x118   : > { %v4162_v21 = vpop.f32.mrf.mxu0  ;;  %v5895_v45 = vpop.f32.mrf.mxu1  ;;  %4784 = vmatprep.subr.bf16.mxu0 %v5943_v4 }
 0x119   : > { %v5897_v16 = vadd.f32 %v4667_v14, %v4161_v44 }
 0x11a   : > { %v4163_v30 = vpop.f32.mrf.mxu0  ;;  %v5899_v19 = vpop.f32.mrf.mxu1 }
 0x11b   : > { %v4164_v42 = vadd.f32 %v4163_v30, %v4162_v21 }
 0x11c   : > { %v5901_v47 = vpop.f32.mrf.mxu0  ;;  %v5903_v48 = vpop.f32.mrf.mxu1 }
 0x11d   : > { %v5905_v54 = vadd.f32 %v4164_v42, %v934_v34 }
 0x11e   : > { %v5907_v56 = vpop.f32.mrf.mxu0  ;;  %v5909_v61 = vpop.f32.mrf.mxu1 }
 0x120   : > { %v4168_v2 = vpop.f32.mrf.mxu0  ;;  %v4232_v7 = vpop.f32.mrf.mxu1 }
 0x122   : > { %v4169_v25 = vpop.f32.mrf.mxu0  ;;  %v4233_v8 = vpop.f32.mrf.mxu1 }
 0x123   : > { %v4170_v11 = vadd.f32 %v4169_v25, %v4168_v2  ;;  %v4234_v12 = vadd.f32 %v4233_v8, %v4232_v7 }
 0x124   : > { %v4171_v13 = vpop.f32.mrf.mxu0  ;;  %v4235_v14 = vpop.f32.mrf.mxu1 }
 0x125   : > { %v5917_v35 = vadd.f32 %v5842_v24, %v4170_v11  ;;  %v5920_v18 = vadd.f32 %v4234_v12, %v5806_v55 }
 0x126   : > { %v4172_v20 = vpop.f32.mrf.mxu0  ;;  %v4236_v58 = vpop.f32.mrf.mxu1 }
 0x127   : > { %v4173_v23 = vadd.f32 %v4172_v20, %v4171_v13  ;;  %v4237_v28 = vadd.f32 %v4236_v58, %v4235_v14 }
 0x128   : > { %v4174_v50 = vpop.f32.mrf.mxu0  ;;  %v4238_v52 = vpop.f32.mrf.mxu1 }
 0x129   : > { %v5924_v51 = vadd.f32 %v5857_v43, %v4173_v23  ;;  %v5926_v3 = vadd.f32 %v4237_v28, %v906_v59 }
 0x12a   : > { %v4175_v34 = vpop.f32.mrf.mxu0  ;;  %v4239_v38 = vpop.f32.mrf.mxu1 }
 0x12b   : > { %v4176_v24 = vadd.f32 %v4175_v34, %v4174_v50  ;;  %v4240_v39 = vadd.f32 %v4239_v38, %v4238_v52  ;;  %v4167_v34 = vadd.f32 %v5907_v56, %v5901_v47 }
 0x12c   : > { %v5928_v46 = vpop.f32.mrf.mxu0  ;;  %v4241_v55 = vpop.f32.mrf.mxu1 }
 0x12d   : > { %v5930_v1 = vadd.f32 %v4176_v24, %v950_v17  ;;  %v5933_v60 = vadd.f32 %v4240_v39, %v5832_v15  ;;  %v4155_v15 = vadd.f32 %v5867_v32, %v5855_v40 }
 0x12e   : > { %v5935_v6 = vpop.f32.mrf.mxu0  ;;  %v4242_v9 = vpop.f32.mrf.mxu1 }
 0x12f   : > { %v4243_v53 = vadd.f32 %v4242_v9, %v4241_v55  ;;  %v922_v2 = vadd.f32 %v4155_v15, %v5837_v22 }
 0x130   : > { %v4180_v43 = vpop.f32.mrf.mxu0  ;;  %v4244_v63 = vpop.f32.mrf.mxu1 }
 0x131   : > { %v5938_v36 = vadd.f32 %v4243_v53, %v5847_v33 }
 0x132   : > { %v4181_v37 = vpop.f32.mrf.mxu0  ;;  %v4245_v62 = vpop.f32.mrf.mxu1 }
 0x133   : > { %v4182_v17 = vadd.f32 %v4181_v37, %v4180_v43  ;;  %v4246_v49 = vadd.f32 %v4245_v62, %v4244_v63 }
 0x134   : > { %v4183_v41 = vpop.f32.mrf.mxu0  ;;  %v4247_v44 = vpop.f32.mrf.mxu1 }
 0x135   : > { %v5949_v21 = vadd.f32 %v5874_v29, %v4182_v17  ;;  %v5952_v33 = vadd.f32 %v4246_v49, %v5862_v31 }
 0x136   : > { %v4184_v30 = vpop.f32.mrf.mxu0  ;;  %v4248_v42 = vpop.f32.mrf.mxu1 }
 0x137   : > { %v4185_v7 = vadd.f32 %v4184_v30, %v4183_v41  ;;  %v4249_v25 = vadd.f32 %v4248_v42, %v4247_v44 }
 0x138   : > { %v4186_v8 = vpop.f32.mrf.mxu0  ;;  %v4250_v40 = vpop.f32.mrf.mxu1 }
 0x139   : > { %v5956_v32 = vadd.f32 %v5885_v5, %v4185_v7  ;;  %v5958_v10 = vadd.f32 %v4249_v25, %v922_v2 }
 0x13a   : > { %v4187_v26 = vpop.f32.mrf.mxu0  ;;  %v4251_v11 = vpop.f32.mrf.mxu1 }
 0x13b   : > { %v4188_v29 = vadd.f32 %v4187_v26, %v4186_v8  ;;  %v4252_v12 = vadd.f32 %v4251_v11, %v4250_v40 }
 0x13c   : > { %v5960_v13 = vpop.f32.mrf.mxu0  ;;  %v4253_v31 = vpop.f32.mrf.mxu1 }
 0x13d   : > { %v5963_v14 = vadd.f32 %v4188_v29, %v5899_v19  ;;  %v1184_v22 = vadd.f32 %v4252_v12, %v5888_v27 }
 0x13e   : > { %v5966_v20 = vpop.f32.mrf.mxu0  ;;  %v4254_v58 = vpop.f32.mrf.mxu1 }
 0x13f   : > { %v4255_v59 = vadd.f32 %v4254_v58, %v4253_v31 }
 0x140   : > { %v4192_v5 = vpop.f32.mrf.mxu0  ;;  %v4256_v23 = vpop.f32.mrf.mxu1 }
 0x141   : > { %v5969_v28 = vadd.f32 %v4255_v59, %v5897_v16  ;;  %v938_v16 = vadd.f32 %v4167_v34, %v5869_v57 }
 0x142   : > { %v4193_v50 = vpop.f32.mrf.mxu0  ;;  %v4257_v52 = vpop.f32.mrf.mxu1 }
 0x143   : > { %v4194_v38 = vadd.f32 %v4193_v50, %v4192_v5  ;;  %v4258_v24 = vadd.f32 %v4257_v52, %v4256_v23 }
 0x144   : > { %v4195_v19 = vpop.f32.mrf.mxu0  ;;  %v4259_v39 = vpop.f32.mrf.mxu1 }
 0x145   : > { %v5974_v27 = vadd.f32 %v5895_v45, %v4194_v38  ;;  %v5977_v55 = vadd.f32 %v4258_v24, %v5905_v54 }
 0x146   : > { %v4196_v9 = vpop.f32.mrf.mxu0  ;;  %v4260_v53 = vpop.f32.mrf.mxu1 }
 0x147   : > { %v4197_v43 = vadd.f32 %v4196_v9, %v4195_v19  ;;  %v4261_v63 = vadd.f32 %v4260_v53, %v4259_v39 }
 0x148   : > { %v4262_v37 = vpop.f32.mrf.mxu1  ;;  %v5980_v62 = vpop.f32.mrf.mxu0 }
 0x149   : > { %v5983_v47 = vadd.f32 %v5903_v48, %v4197_v43  ;;  %v5985_v56 = vadd.f32 %v4261_v63, %v938_v16 }
 0x14a   : > { %v4263_v15 = vpop.f32.mrf.mxu1  ;;  %v1272_v45 = vpop.f32.mrf.mxu0 }
 0x14b   : > { %v4264_v17 = vadd.f32 %v4263_v15, %v4262_v37  ;;  %v5988_v54 = vadd.f32 %v1272_v45, %v5920_v18  ;;  %v4179_v18 = vadd.f32 %v5935_v6, %v5928_v46  ;;  %v4191_v37 = vadd.f32 %v5966_v20, %v5960_v13 }
 0x14c   : > { %v4265_v49 = vpop.f32.mrf.mxu1  ;;  %v5990_v41 = vpop.f32.mrf.mxu0 }
 0x14d   : > { %v1200_v57 = vadd.f32 %v4264_v17, %v5917_v35 }
 0x14e   : > { %v4266_v44 = vpop.f32.mrf.mxu1  ;;  %v5993_v30 = vpop.f32.mrf.mxu0 }
 0x14f   : > { %v4267_v42 = vadd.f32 %v4266_v44, %v4265_v49 }
 0x150   : > { %v4268_v2 = vpop.f32.mrf.mxu1  ;;  %v4702_v48 = vpop.f32.mrf.mxu0 }
 0x151   : > { %v5995_v7 = vadd.f32 %v4702_v48, %v1184_v22  ;;  %v1203_v25 = vadd.f32 %v4267_v42, %v5924_v51  ;;  %v954_v22 = vadd.f32 %v4179_v18, %v5890_v0 }
 0x152   : > { %v4269_v8 = vpop.f32.mrf.mxu1  ;;  %v5998_v40 = vpop.f32.mrf.mxu0 }
 0x153   : > { %v4270_v26 = vadd.f32 %v4269_v8, %v4268_v2  ;;  %v970_v2 = vadd.f32 %v4191_v37, %v5909_v61 }
 0x154   : > { %v4271_v11 = vpop.f32.mrf.mxu1  ;;  %v6002_v29 = vpop.f32.mrf.mxu0 }
 0x155   : > { %v1208_v35 = vadd.f32 %v4270_v26, %v5930_v1 }
 0x156   : > { %v4272_v12 = vpop.f32.mrf.mxu1  ;;  %v6005_v31 = vpop.f32.mrf.mxu0 }
 0x157   : > { %v4273_v58 = vadd.f32 %v4272_v12, %v4271_v11 }
 0x158   : > { %v4274_v59 = vpop.f32.mrf.mxu1  ;;  %v4706_v51 = vpop.f32.mrf.mxu0 }
 0x159   : > { %v6008_v5 = vadd.f32 %v4706_v51, %v1200_v57  ;;  %v1211_v23 = vadd.f32 %v4273_v58, %v954_v22 }
 0x15a   : > { %v4275_v50 = vpop.f32.mrf.mxu1  ;;  %v6010_v52 = vpop.f32.mrf.mxu0 }
 0x15b   : > { %v4276_v46 = vadd.f32 %v4275_v50, %v4274_v59 }
 0x15c   : > { %v4277_v6 = vpop.f32.mrf.mxu1  ;;  %v4707_v34 = vpop.f32.mrf.mxu0 }
 0x15d   : > { %v6012_v38 = vadd.f32 %v4707_v34, %v1203_v25  ;;  %v1216_v1 = vadd.f32 %v4276_v46, %v5949_v21 }
 0x15e   : > { %v4278_v24 = vpop.f32.mrf.mxu1  ;;  %v6015_v19 = vpop.f32.mrf.mxu0 }
 0x15f   : > { %v4279_v0 = vadd.f32 %v4278_v24, %v4277_v6 }
 0x160   : > { %v4280_v39 = vpop.f32.mrf.mxu1  ;;  %v4710_v9 = vpop.f32.mrf.mxu0 }
 0x161   : > { %v6017_v53 = vadd.f32 %v4710_v9, %v1216_v1  ;;  %v1219_v16 = vadd.f32 %v4279_v0, %v5956_v32 }
 0x162   : > { %v4281_v43 = vpop.f32.mrf.mxu1  ;;  %v1320_v63 = vpop.f32.mrf.mxu0 }
 0x163   : > { %v4282_v15 = vadd.f32 %v4281_v43, %v4280_v39  ;;  %v6022_v45 = vadd.f32 %v1320_v63, %v1208_v35 }
 0x164   : > { %v4283_v17 = vpop.f32.mrf.mxu1  ;;  %v4711_v21 = vpop.f32.mrf.mxu0 }
 0x165   : > { %v6024_v49 = vadd.f32 %v4711_v21, %v1219_v16  ;;  %v1224_v57 = vadd.f32 %v4282_v15, %v5963_v14  ;;  %v6046_v16 = vld [vmem:[%s7009_s2] ss:$0 sm:$0xff] }
 0x166   : > { %v4284_v44 = vpop.f32.mrf.mxu1  ;;  %v1323_v42 = vpop.f32.mrf.mxu0 }
 0x167   : > { %v4285_v32 = vadd.f32 %v4284_v44, %v4283_v17  ;;  %v6028_v48 = vadd.f32 %v1323_v42, %v1211_v23  ;;  %v1276_v17 = vadd.f32 %v5993_v30, %v5926_v3 }
 0x168   : > { %v4286_v25 = vpop.f32.mrf.mxu1  ;;  %v4714_v8 = vpop.f32.mrf.mxu0 }
 0x169   : > { %v1227_v13 = vadd.f32 %v4285_v32, %v970_v2 }
 0x16a   : > { %v4287_v20 = vpop.f32.mrf.mxu1  ;;  %v1336_v18 = vpop.f32.mrf.mxu0 }
 0x16b   : > { %v4288_v26 = vadd.f32 %v4287_v20, %v4286_v25  ;;  %v6030_v11 = vadd.f32 %v1336_v18, %v1224_v57  ;;  %v1281_v20 = vadd.f32 %v5980_v62, %v5933_v60  ;;  %v1284_v60 = vadd.f32 %v5990_v41, %v5938_v36 }
 0x16c   : > { %v4289_v35 = vpop.f32.mrf.mxu1  ;;  %v4715_v12 = vpop.f32.mrf.mxu0  ;;  %v1289_v41 = vadd.f32 %v5998_v40, %v5952_v33 }
 0x16d   : > { %v1232_v14 = vadd.f32 %v4288_v26, %v5974_v27  ;;  %v6041_v27 = vstv %s3848_s16  ;;  %s6855_s16 = scalar_lea.vmem [#allocation2], %s6825_s15  ;;  %s5095_s15 = sshll.u32 %s5186_s17, 4  ;;  %s5096_s15 = int_to_ptr.vmem [resolvable:$false] %s5095_s15 }
 0x16e   : > { %v4290_v22 = vpop.f32.mrf.mxu1  ;;  %v1339_v58 = vpop.f32.mrf.mxu0  ;;  %vm1866_vm2 = vcmp.ge.s32.totalorder %v6041_v27, 0  ;;  %vm1876_vm3 = vcmp.lt.s32.totalorder %v6041_v27, 16  ;;  %v1857_v2 = vadd.s32 1, %v6041_v27  ;;  %s5097_s26 = scalar_lea.vmem %s5096_s15, 4096 }
 0x16f   : > { %v6034_v59 = vadd.f32 %v4714_v8, %v1232_v14  ;;  %v4291_v61 = vadd.f32 %v4290_v22, %v4289_v35  ;;  %v6036_v51 = vadd.f32 %v1339_v58, %v1227_v13  ;;  %vm6054_vm4 = vmand %vm1866_vm2, %vm1876_vm3  ;;  %v1858_v35 = vadd.s32 2, %v6041_v27 }
 0x170   : > { %v4326_v23 = vpop.f32.mrf.mxu0  ;;  %v4734_v50 = vpop.f32.mrf.mxu1  ;;  %vm1867_vm5 = vcmp.ge.s32.totalorder %v1857_v2, 0  ;;  %vm1877_vm6 = vcmp.lt.s32.totalorder %v1857_v2, 16  ;;  %vm6158_vm3 = vmneg %vm1956_vm7 }
 0x171   : > { %v1235_v46 = vadd.f32 %v4291_v61, %v5983_v47  ;;  %vm6075_vm8 = vmand %vm1867_vm5, %vm1877_vm6  ;;  %vm1868_vm9 = vcmp.ge.s32.totalorder %v1858_v35, 0  ;;  %vm1878_vm10 = vcmp.lt.s32.totalorder %v1858_v35, 16 }
 0x172   : > { %v4327_v6 = vpop.f32.mrf.mxu0  ;;  %v1710_v34 = vpop.f32.mrf.mxu1  ;;  %vm6114_vm13 = vmand %vm1868_vm9, %vm1878_vm10 }
 0x173   : > { %v6039_v1 = vadd.f32 %v4715_v12, %v1235_v46  ;;  %v4328_v24 = vadd.f32 %v4327_v6, %v4326_v23 }
 0x174   : > { %v4329_v0 = vpop.f32.mrf.mxu0  ;;  %v4735_v39 = vpop.f32.mrf.mxu1 }
 0x175   : > { %v1711_v9 = vadd.f32 %v4328_v24, %v1710_v34 }
 0x176   : > { %v4330_v43 = vpop.f32.mrf.mxu0  ;;  %v1713_v63 = vpop.f32.mrf.mxu1 }
 0x177   : > { %v1789_v47 = vadd.f32 %v1711_v9, %v5988_v54  ;;  %v4331_v37 = vadd.f32 %v4330_v43, %v4329_v0  ;;  %v6080_v0 = vadd.s32 3, %v6041_v27 }
 0x178   : > { %v4332_v15 = vpop.f32.mrf.mxu0  ;;  %v6059_v13 = vpop.f32.mrf.mxu1 }
 0x179   : > { %v1815_v21 = vadd.f32 %v6046_v16, %v1789_v47  ;;  %v1714_v57 = vadd.f32 %v4331_v37, %v1713_v63  ;;  %vm1869_vm11 = vcmp.ge.s32.totalorder %v6080_v0, 0  ;;  %vm1879_vm12 = vcmp.lt.s32.totalorder %v6080_v0, 16 }
 0x17a   : > { %v4333_v42 = vpop.f32.mrf.mxu0  ;;  %v1726_v61 = vpop.f32.mrf.mxu1  ;;  %vm6149_vm2 = vmand %vm1869_vm11, %vm1879_vm12 }
 0x17b   : > { %v1835_v54 = vmax.f32 %v1815_v21, 0.0  ;;  %v1790_v32 = vadd.f32 %v1714_v57, %v1276_v17  ;;  %v4334_v25 = vadd.f32 %v4333_v42, %v4332_v15  ;;  %v6100_v42 = vadd.s32 4, %v6041_v27 }
 0x17c   : > { %v4335_v8 = vpop.f32.mrf.mxu0  ;;  %v6084_v63 = vpop.f32.mrf.mxu1 }
 0x17d   : > { %v1916_v3 = vsel %vm6054_vm4, %v1835_v54, 0.0  ;;  %v1816_v30 = vadd.f32 %v6046_v16, %v1790_v32  ;;  %v1719_v18 = vadd.f32 %v4734_v50, %v4334_v25  ;;  %vm1870_vm14 = vcmp.ge.s32.totalorder %v6100_v42, 0 }
 0x17e   : > { %v4336_v26 = vpop.f32.mrf.mxu0  ;;  %v6067_v58 = vrot.slane %v1916_v3, 7  ;;  %v1292_v3 = vadd.f32 %v6005_v31, %v5958_v10  ;;  %vm1880_vm15 = vcmp.lt.s32.totalorder %v6100_v42, 16 }
 0x17f   : > { %v1836_v12 = vmax.f32 %v1816_v30, 0.0  ;;  %v1791_v14 = vadd.f32 %v1719_v18, %v1281_v20  ;;  %v4337_v22 = vadd.f32 %v4336_v26, %v4335_v8  ;;  %v1729_v30 = vpop.f32.mrf.mxu1  ;;  %v6107_v26 = vadd.s32 5, %v6041_v27  ;;  %vm6212_vm9 = vmand %vm1870_vm14, %vm1880_vm15 }
 0x180   : > { %v4338_v23 = vpop.f32.mrf.mxu0  ;;  %v2017_v37 = vsel %vm1956_vm7, 0.0, %v6067_v58 }
 0x181   : > { %v1917_v62 = vsel %vm6054_vm4, %v1836_v12, 0.0  ;;  %v1817_v50 = vadd.f32 %v6046_v16, %v1791_v14  ;;  %v1722_v46 = vadd.f32 %v4735_v39, %v4337_v22  ;;  %vm5185_vm4 = vmmov 1  }
 0x182   : > { %v1958_v6 = vrot.slane %v1917_v62, 7  ;;  %v4339_v24 = vpop.f32.mrf.mxu0  ;;  %vm6173_vm5 = vmpackc.low %vm5185_vm4, %vm6158_vm3  ;;  %vm1871_vm6 = vcmp.ge.s32.totalorder %v6107_v26, 0 }
 0x183   : > { %v1837_v9 = vmax.f32 %v1817_v50, 0.0  ;;  %v1792_v43 = vadd.f32 %v1722_v46, %v1284_v60  ;;  %v4340_v36 = vadd.f32 %v4339_v24, %v4338_v23 }
 0x184   : > { %v4341_v39 = vpop.f32.mrf.mxu0  ;;  %v6088_v47 = vsel %vm1956_vm7, %v6067_v58, %v1958_v6  ;;  %v2027_v15 = vsel %vm1956_vm7, %v1958_v6, 0.0 }
 0x185   : > { %v1918_v17 = vsel %vm6075_vm8, %v1837_v9, 0.0  ;;  %v1818_v21 = vadd.f32 %v6046_v16, %v1792_v43  ;;  %v1727_v57 = vadd.f32 %v4340_v36, %v1726_v61  ;;  %v2038_v33 = vpack.c.bf16 %v6088_v47, %v2017_v37 }
 0x186   : > { %v1960_v40 = vrot.slane %v1918_v17, 7  ;;  %v4342_v44 = vpop.f32.mrf.mxu0  ;;  %v2039_v2 = vpack.c.bf16 %v2027_v15, %v2027_v15  ;;  %v3979_v54 = vpack.c.bf16 %v6088_v47, %v6067_v58  ;;  %v5051_v58 = vld [vmem:[%s7010_s3 + $0x1a0] sm:$0xff]   ;;  %v5053_v47 = vld [vmem:[%s7010_s3 + $0x1d8] sm:$0xff]  }
 0x187   : > { %v1838_v32 = vmax.f32 %v1818_v21, 0.0  ;;  %v1793_v25 = vadd.f32 %v1727_v57, %v1289_v41  ;;  %v4343_v8 = vadd.f32 %v4342_v44, %v4341_v39  ;;  %v2178_v20 = vrot.slane %v2038_v33, 1  ;;  %v6122_v41 = vpop.f32.mrf.mxu1 }
 0x188   : > { %v4344_v18 = vpop.f32.mrf.mxu0  ;;  %v2179_v12 = vrot.slane %v2039_v2, 1  ;;  %v2061_v14 = vshll.u32 %v2038_v33, 16  ;;  %v2066_v60 = vshll.u32 %v2039_v2, 16  ;;  %v2059_v46 = vshrl.u32 %v2038_v33, 16 }
 0x189   : > { %v1919_v22 = vsel %vm6075_vm8, %v1838_v32, 0.0  ;;  %v1819_v61 = vadd.f32 %v6046_v16, %v1793_v25  ;;  %v1730_v23 = vadd.f32 %v4343_v8, %v1729_v30  ;;  %v2018_v43 = vsel %vm1956_vm7, 0.0, %v1960_v40 }
 0x18a   : > { %v1961_v62 = vrot.slane %v1919_v22, 7  ;;  %v4345_v10 = vpop.f32.mrf.mxu0  ;;  %v6119_v31 = vsel %vm454_vm0, %v2178_v20, %v2179_v12  ;;  %v2063_v6 = vrot.slane %v2061_v14, 1  ;;  %v2068_v15 = vrot.slane %v2066_v60, 1 }
 0x18b   : > { %v1839_v24 = vmax.f32 %v1819_v61, 0.0  ;;  %v1794_v34 = vadd.f32 %v1730_v23, %v1292_v3  ;;  %v4346_v9 = vadd.f32 %v4345_v10, %v4344_v18  ;;  %v1305_v12 = vadd.f32 %v6010_v52, %v5977_v55 }
 0x18c   : > { %v4347_v36 = vpop.f32.mrf.mxu0  ;;  %v1962_v35 = vsel %vm1956_vm7, %v1960_v40, %v1961_v62  ;;  %v2028_v39 = vsel %vm1956_vm7, %v1961_v62, 0.0  ;;  %v2064_v37 = vor.u32 %v2063_v6, %v2059_v46  ;;  %vm1881_vm8 = vcmp.lt.s32.totalorder %v6107_v26, 16  ;;  %v5028_v46 = vld [vmem:[%s7010_s3 + $0xb0] sm:$0xff]  }
 0x18d   : > { %v1920_v17 = vsel %vm6114_vm13, %v1839_v24, 0.0  ;;  %v1820_v21 = vadd.f32 %v6046_v16, %v1794_v34  ;;  %v1735_v57 = vadd.f32 %v6059_v13, %v4346_v9  ;;  %v2040_v33 = vpack.c.bf16 %v1962_v35, %v2018_v43  ;;  %vm6271_vm12 = vmand %vm1871_vm6, %vm1881_vm8 }
 0x18e   : > { %v1963_v44 = vrot.slane %v1920_v17, 7  ;;  %v4348_v2 = vpop.f32.mrf.mxu0  ;;  %v2041_v32 = vpack.c.bf16 %v2028_v39, %v2028_v39  ;;  %v6130_v25 = vpack.c.bf16 %v1962_v35, %v1960_v40  ;;  %v6133_v8 = vsel %vm303_vm1, %v2064_v37, %v2068_v15  ;;  %v1742_v40 = vpop.f32.mrf.mxu1 }
 0x18f   : > { %v1840_v20 = vmax.f32 %v1820_v21, 0.0  ;;  %v1795_v3 = vadd.f32 %v1735_v57, %v5995_v7  ;;  %v4349_v30 = vadd.f32 %v4348_v2, %v4347_v36  ;;  %v2181_v18 = vrot.slane %v2040_v33, 1 }
 0x190   : > { %v1300_v13 = vadd.f32 %v6002_v29, %v5969_v28  ;;  %v4350_v14 = vpop.f32.mrf.mxu0  ;;  %v2182_v22 = vrot.slane %v2041_v32, 1  ;;  %v2073_v61 = vshll.u32 %v2040_v33, 16  ;;  %v2078_v55 = vshll.u32 %v2041_v32, 16  ;;  %v6166_v43 = vpop.f32.mrf.mxu1 }
 0x191   : > { %v1921_v23 = vsel %vm6114_vm13, %v1840_v20, 0.0  ;;  %v1821_v7 = vadd.f32 %v6046_v16, %v1795_v3  ;;  %v1738_v28 = vadd.f32 %v6084_v63, %v4349_v30  ;;  %v2071_v50 = vshrl.u32 %v2040_v33, 16  ;;  %v5020_v33 = vld [vmem:[%s7010_s3 + $0x38] sm:$0xff]  }
 0x192   : > { %v1964_v29 = vrot.slane %v1921_v23, 7  ;;  %v4351_v52 = vpop.f32.mrf.mxu0  ;;  %v6155_v62 = vsel %vm454_vm0, %v2181_v18, %v2182_v22  ;;  %v2075_v10 = vrot.slane %v2073_v61, 1  ;;  %v2019_v0 = vsel %vm1956_vm7, 0.0, %v1963_v44  ;;  %v5021_v18 = vld [vmem:[%s7010_s3 + $0x70] sm:$0xff]   ;;  %v1745_v61 = vpop.f32.mrf.mxu1 }
 0x193   : > { %v1841_v6 = vmax.f32 %v1821_v7, 0.0  ;;  %v1796_v24 = vadd.f32 %v1738_v28, %v1300_v13  ;;  %v4352_v34 = vadd.f32 %v4351_v52, %v4350_v14  ;;  %4768 = vmatprep.mubr.bf16.mxu0 %v6155_v62  ;;  %v2080_v39 = vrot.slane %v2078_v55, 1 }
 0x194   : > { %v1965_v63 = vsel %vm1956_vm7, %v1963_v44, %v1964_v29  ;;  %v2029_v9 = vsel %vm1956_vm7, %v1964_v29, 0.0  ;;  %v4353_v36 = vpop.f32.mrf.mxu0  ;;  %v2076_v35 = vor.u32 %v2075_v10, %v2071_v50  ;;  %v6195_v55 = vadd.s32 6, %v6041_v27  ;;  %v5022_v10 = vld [vmem:[%s7010_s3 + $0x30] sm:$0xff]  }
 0x195   : > { %v2043_v37 = vpack.c.bf16 %v2029_v9, %v2029_v9  ;;  %v1922_v15 = vsel %vm6149_vm2, %v1841_v6, 0.0  ;;  %v1822_v17 = vadd.f32 %v6046_v16, %v1796_v24  ;;  %v1743_v21 = vadd.f32 %v4352_v34, %v1742_v40  ;;  %v5023_v34 = vld [vmem:[%s7010_s3 + $0x68] sm:$0xff]  }
 0x196   : > { %v1966_v2 = vrot.slane %v1922_v15, 7  ;;  %v4354_v32 = vpop.f32.mrf.mxu0  ;;  %v6181_v20 = vsel %vm303_vm1, %v2076_v35, %v2080_v39  ;;  %v2042_v3 = vpack.c.bf16 %v1965_v63, %v2019_v0  ;;  %v6183_v30 = vpack.c.bf16 %v1965_v63, %v1963_v44  ;;  %v6224_v39 = vpop.f32.mrf.mxu1 }
 0x197   : > { %v1842_v13 = vmax.f32 %v1822_v17, 0.0  ;;  %v1797_v40 = vadd.f32 %v1743_v21, %v1305_v12  ;;  %v4355_v14 = vadd.f32 %v4354_v32, %v4353_v36  ;;  %2502 = vmatprep.mubr.bf16.mxu1 %v6181_v20  ;;  %v2185_v22 = vrot.slane %v2043_v37, 1 }
 0x198   : > { %3924 = vmatmul.mubr.msk.bf16.vlgmr.msra.gmra.mxu1 %vm6173_vm5, %v6130_v25  ;;  %v4356_v44 = vpop.f32.mrf.mxu0  ;;  %v2184_v23 = vrot.slane %v2042_v3, 1  ;;  %v2085_v7 = vshll.u32 %v2042_v3, 16  ;;  %v2090_v28 = vshll.u32 %v2043_v37, 16  ;;  %v1308_v12 = vadd.f32 %v6015_v19, %v5985_v56 }
 0x199   : > { %v1923_v29 = vsel %vm6149_vm2, %v1842_v13, 0.0  ;;  %v1823_v52 = vadd.f32 %v6046_v16, %v1797_v40  ;;  %v1746_v50 = vadd.f32 %v4355_v14, %v1745_v61  ;;  %4485 = vmatpush3.bf16.msra.mxu1 %v5020_v33  ;;  %v2083_v6 = vshrl.u32 %v2042_v3, 16  ;;  %v5024_v13 = vld [vmem:[%s7010_s3 + $0x28] sm:$0xff]  }
 0x19a   : > { %v1967_v0 = vrot.slane %v1923_v29, 7  ;;  %v4357_v19 = vpop.f32.mrf.mxu0  ;;  %v6217_v60 = vsel %vm454_vm0, %v2184_v23, %v2185_v22  ;;  %v2087_v24 = vrot.slane %v2085_v7, 1  ;;  %4486 = vmatprep.subr.bf16.mxu1 %v5021_v18  ;;  %v2020_v42 = vsel %vm1956_vm7, 0.0, %v1966_v2  ;;  %v5031_v40 = vld [vmem:[%s7010_s3 + $0xa8] sm:$0xff]   ;;  %v1758_v29 = vpop.f32.mrf.mxu1 }
 0x19b   : > { %v1843_v63 = vmax.f32 %v1823_v52, 0.0  ;;  %v1798_v9 = vadd.f32 %v1746_v50, %v1308_v12  ;;  %v4358_v36 = vadd.f32 %v4357_v19, %v4356_v44  ;;  %4769 = vmatmul.mubr.bf16.vlgmr.msra.gmra.mxu0 %v6217_v60  ;;  %v2092_v15 = vrot.slane %v2090_v28, 1 }
 0x19c   : > { %v4359_v35 = vpop.f32.mrf.mxu0  ;;  %v2088_v37 = vor.u32 %v2087_v24, %v2083_v6  ;;  %v1968_v17 = vsel %vm1956_vm7, %v1966_v2, %v1967_v0  ;;  %v2030_v21 = vsel %vm1956_vm7, %v1967_v0, 0.0  ;;  %4785 = vmatpush3.bf16.msra.mxu0 %v5943_v4  ;;  %vm1872_vm10 = vcmp.ge.s32.totalorder %v6195_v55, 0  ;;  %v5026_v24 = vld [vmem:[%s7010_s3 + $0x20] sm:$0xff]  }
 0x19d   : > { %v1924_v33 = vsel %vm6212_vm9, %v1843_v63, 0.0  ;;  %v1824_v32 = vadd.f32 %v6046_v16, %v1798_v9  ;;  %v1751_v3 = vadd.f32 %v6122_v41, %v4358_v36  ;;  %4487 = vmatpush3.bf16.msra.mxu1 %v5022_v10  ;;  %v2044_v18 = vpack.c.bf16 %v1968_v17, %v2020_v42  ;;  %4786 = vmatprep.subr.bf16.mxu0 %v5028_v46  ;;  %v5025_v41 = vld [vmem:[%s7010_s3 + $0x60] sm:$0xff]   ;;  %v5029_v42 = vld [vmem:[%s7010_s3 + $0x58] sm:$0xff]  }
 0x19e   : > { %v1969_v14 = vrot.slane %v1924_v33, 7  ;;  %v4360_v4 = vpop.f32.mrf.mxu0  ;;  %v6240_v22 = vsel %vm303_vm1, %v2088_v37, %v2092_v15  ;;  %v2045_v61 = vpack.c.bf16 %v2030_v21, %v2030_v21  ;;  %v6242_v44 = vpack.c.bf16 %v1968_v17, %v1966_v2  ;;  %4488 = vmatprep.subr.bf16.mxu1 %v5023_v34  ;;  %v6284_v17 = vpop.f32.mrf.mxu1 }
 0x19f   : > { %v1844_v23 = vmax.f32 %v1824_v32, 0.0  ;;  %v1799_v7 = vadd.f32 %v1751_v3, %v6008_v5  ;;  %v4361_v28 = vadd.f32 %v4360_v4, %v4359_v35  ;;  %2510 = vmatprep.mubr.bf16.mxu1 %v6240_v22  ;;  %v2187_v12 = vrot.slane %v2044_v18, 1 }
 0x1a0   : > { %3928 = vmatmul.mubr.msk.bf16.gmra.mxu1 %vm6173_vm5, %v6183_v30  ;;  %v4362_v2 = vpop.f32.mrf.mxu0  ;;  %vm1882_vm11 = vcmp.lt.s32.totalorder %v6195_v55, 16  ;;  %v2188_v52 = vrot.slane %v2045_v61, 1  ;;  %v2097_v50 = vshll.u32 %v2044_v18, 16  ;;  %v2102_v10 = vshll.u32 %v2045_v61, 16  ;;  %4787 = vmatpush3.bf16.msra.mxu0 %v5028_v46  ;;  %v5032_v46 = vld [vmem:[%s7010_s3 + $0xa0] sm:$0xff]  }
 0x1a1   : > { %v1925_v5 = vsel %vm6212_vm9, %v1844_v23, 0.0  ;;  %v1825_v0 = vadd.f32 %v6046_v16, %v1799_v7  ;;  %v1754_v19 = vadd.f32 %v6166_v43, %v4361_v28  ;;  %4489 = vmatpush3.bf16.msra.mxu1 %v5024_v13  ;;  %v6259_v6 = vadd.s32 7, %v6041_v27  ;;  %4788 = vmatprep.subr.bf16.mxu0 %v5031_v40  ;;  %v5035_v23 = vld [vmem:[%s7010_s3 + $0x98] sm:$0xff]   ;;  %vm6328_vm15 = vmand %vm1872_vm10, %vm1882_vm11 }
 0x1a2   : > { %v1970_v34 = vrot.slane %v1925_v5, 7  ;;  %v4363_v56 = vpop.f32.mrf.mxu0  ;;  %v6276_v63 = vsel %vm454_vm0, %v2187_v12, %v2188_v52  ;;  %v2095_v9 = vshrl.u32 %v2044_v18, 16  ;;  %v2099_v36 = vrot.slane %v2097_v50, 1  ;;  %4490 = vmatprep.subr.bf16.mxu1 %v5025_v41  ;;  %v5030_v41 = vld [vmem:[%s7010_s3 + $0x18] sm:$0xff]  }
 0x1a3   : > { %v1845_v35 = vmax.f32 %v1825_v0, 0.0  ;;  %v1800_v37 = vadd.f32 %v1754_v19, %v6012_v38  ;;  %v4364_v15 = vadd.f32 %v4363_v56, %v4362_v2  ;;  %4772 = vmatprep.mubr.bf16.mxu0 %v6276_v63  ;;  %v2021_v26 = vsel %vm1956_vm7, 0.0, %v1969_v14  ;;  %v1761_v0 = vpop.f32.mrf.mxu1 }
 0x1a4   : > { %v4365_v21 = vpop.f32.mrf.mxu0  ;;  %v2100_v33 = vor.u32 %v2099_v36, %v2095_v9  ;;  %v2104_v32 = vrot.slane %v2102_v10, 1  ;;  %v1971_v3 = vsel %vm1956_vm7, %v1969_v14, %v1970_v34  ;;  %v2031_v18 = vsel %vm1956_vm7, %v1970_v34, 0.0  ;;  %4789 = vmatpush3.bf16.msra.mxu0 %v5031_v40 }
 0x1a5   : > { %v1926_v13 = vsel %vm6271_vm12, %v1845_v35, 0.0  ;;  %v1826_v38 = vadd.f32 %v6046_v16, %v1800_v37  ;;  %v1759_v4 = vadd.f32 %v4364_v15, %v1758_v29  ;;  %v2046_v61 = vpack.c.bf16 %v1971_v3, %v2021_v26  ;;  %4491 = vmatpush3.bf16.msra.mxu1 %v5026_v24  ;;  %4790 = vmatprep.subr.bf16.mxu0 %v5032_v46  ;;  %v5033_v29 = vld [vmem:[%s7010_s3 + $0x50] sm:$0xff]  }
 0x1a6   : > { %v1972_v7 = vrot.slane %v1926_v13, 7  ;;  %v4366_v28 = vpop.f32.mrf.mxu0  ;;  %v6298_v40 = vsel %vm303_vm1, %v2100_v33, %v2104_v32  ;;  %v2047_v12 = vpack.c.bf16 %v2031_v18, %v2031_v18  ;;  %v6300_v2 = vpack.c.bf16 %v1971_v3, %v1969_v14  ;;  %4492 = vmatprep.subr.bf16.mxu1 %v5029_v42  ;;  %v5034_v42 = vld [vmem:[%s7010_s3 + $0x10] sm:$0xff]   ;;  %v5037_v33 = vld [vmem:[%s7010_s3 + $0x48] sm:$0xff]  }
 0x1a7   : > { %v1846_v52 = vmax.f32 %v1826_v38, 0.0  ;;  %v1801_v50 = vadd.f32 %v1759_v4, %v6022_v45  ;;  %v4367_v10 = vadd.f32 %v4366_v28, %v4365_v21  ;;  %2518 = vmatprep.mubr.bf16.mxu1 %v6298_v40  ;;  %vm1873_vm13 = vcmp.ge.s32.totalorder %v6259_v6, 0  ;;  %v5036_v35 = vld [vmem:[%s7010_s3 + $0x90] sm:$0xff]   ;;  %v6341_v38 = vpop.f32.mrf.mxu1 }
 0x1a8   : > { %v2190_v5 = vrot.slane %v2046_v61, 1  ;;  %3932 = vmatmul.mubr.msk.bf16.gmra.mxu1 %vm6173_vm5, %v6242_v44  ;;  %v4368_v14 = vpop.f32.mrf.mxu0  ;;  %vm1883_vm14 = vcmp.lt.s32.totalorder %v6259_v6, 16  ;;  %v2191_v19 = vrot.slane %v2047_v12, 1  ;;  %v2109_v24 = vshll.u32 %v2046_v61, 16  ;;  %4791 = vmatpush3.bf16.msra.mxu0 %v5032_v46 }
 0x1a9   : > { %v2114_v34 = vshll.u32 %v2047_v12, 16  ;;  %v1927_v45 = vsel %vm6271_vm12, %v1846_v52, 0.0  ;;  %v1827_v56 = vadd.f32 %v6046_v16, %v1801_v50  ;;  %v1762_v9 = vadd.f32 %v4367_v10, %v1761_v0  ;;  %4493 = vmatpush3.bf16.msra.mxu1 %v5030_v41  ;;  %4792 = vmatprep.subr.bf16.mxu0 %v5035_v23  ;;  %v5038_v50 = vld [vmem:[%s7010_s3 + $0x8] sm:$0xff]   ;;  %vm6387_vm4 = vmand %vm1873_vm13, %vm1883_vm14 }
 0x1aa   : > { %v6316_v36 = vadd.s32 8, %v6041_v27  ;;  %v1973_v46 = vrot.slane %v1927_v45, 7  ;;  %v4369_v37 = vpop.f32.mrf.mxu0  ;;  %v6333_v15 = vsel %vm454_vm0, %v2190_v5, %v2191_v19  ;;  %v2107_v26 = vshrl.u32 %v2046_v61, 16  ;;  %4494 = vmatprep.subr.bf16.mxu1 %v5033_v29  ;;  %v5039_v10 = vld [vmem:[%s7010_s3 + $0x88] sm:$0xff]  }
 0x1ab   : > { %v2111_v21 = vrot.slane %v2109_v24, 1  ;;  %v1847_v32 = vmax.f32 %v1827_v56, 0.0  ;;  %v1802_v3 = vadd.f32 %v1762_v9, %v6028_v48  ;;  %v4370_v18 = vadd.f32 %v4369_v37, %v4368_v14  ;;  %4773 = vmatmul.mubr.bf16.gmra.mxu0 %v6333_v15  ;;  %v1774_v9 = vpop.f32.mrf.mxu1 }
 0x1ac   : > { %v2022_v55 = vsel %vm1956_vm7, 0.0, %v1972_v7  ;;  %v4371_v13 = vpop.f32.mrf.mxu0  ;;  %v2116_v41 = vrot.slane %v2114_v34, 1  ;;  %v1974_v61 = vsel %vm1956_vm7, %v1972_v7, %v1973_v46  ;;  %v2032_v28 = vsel %vm1956_vm7, %v1973_v46, 0.0  ;;  %4793 = vmatpush3.bf16.msra.mxu0 %v5035_v23 }
 0x1ad   : > { %v2112_v4 = vor.u32 %v2111_v21, %v2107_v26  ;;  %v1928_v12 = vsel %vm6328_vm15, %v1847_v32, 0.0  ;;  %v1828_v48 = vadd.f32 %v6046_v16, %v1802_v3  ;;  %v1767_v29 = vadd.f32 %v6224_v39, %v4370_v18  ;;  %4495 = vmatpush3.bf16.msra.mxu1 %v5034_v42  ;;  %4794 = vmatprep.subr.bf16.mxu0 %v5036_v35  ;;  %v5041_v39 = vld [vmem:[%s7010_s3 + $0x40] sm:$0xff]  }
 0x1ae   : > { %v2048_v52 = vpack.c.bf16 %v1974_v61, %v2022_v55  ;;  %v1975_v5 = vrot.slane %v1928_v12, 7  ;;  %v4372_v23 = vpop.f32.mrf.mxu0  ;;  %v2049_v14 = vpack.c.bf16 %v2032_v28, %v2032_v28  ;;  %v6358_v19 = vpack.c.bf16 %v1974_v61, %v1972_v7  ;;  %4496 = vmatprep.subr.bf16.mxu1 %v5037_v33  ;;  %v5040_v32 = vld [vmem:[%s7010_s3 + $0x80] sm:$0xff]   ;;  %v6402_v28 = vpop.f32.mrf.mxu1 }
 0x1af   : > { %v6356_v0 = vsel %vm303_vm1, %v2112_v4, %v2116_v41  ;;  %v1848_v24 = vmax.f32 %v1828_v48, 0.0  ;;  %v1803_v34 = vadd.f32 %v1767_v29, %v6017_v53  ;;  %v4373_v45 = vadd.f32 %v4372_v23, %v4371_v13  ;;  %v6397_v13 = vld [vmem:[%s7010_s3 + $0x238] sm:$0xff]  }
 0x1b0   : > { %2526 = vmatprep.mubr.bf16.mxu1 %v6356_v0  ;;  %vm1874_vm2 = vcmp.ge.s32.totalorder %v6316_v36, 0  ;;  %v2193_v56 = vrot.slane %v2048_v52, 1  ;;  %v4374_v7 = vpop.f32.mrf.mxu0  ;;  %vm1884_vm3 = vcmp.lt.s32.totalorder %v6316_v36, 16  ;;  %v2194_v42 = vrot.slane %v2049_v14, 1  ;;  %4795 = vmatpush3.bf16.msra.mxu0 %v5036_v35  ;;  %v5042_v35 = vld [vmem:[%s7010_s3] sm:$0xff]  }
 0x1b1   : > { %3936 = vmatmul.mubr.msk.bf16.gmra.mxu1 %vm6173_vm5, %v6300_v2  ;;  %v2121_v46 = vshll.u32 %v2048_v52, 16  ;;  %v2126_v37 = vshll.u32 %v2049_v14, 16  ;;  %v1929_v53 = vsel %vm6328_vm15, %v1848_v24, 0.0  ;;  %v1829_v26 = vadd.f32 %v6046_v16, %v1803_v34  ;;  %4796 = vmatprep.subr.bf16.mxu0 %v5039_v10  ;;  %v5043_v24 = vld [vmem:[%s7010_s3 + $0x1f8] sm:$0xff]   ;;  %vm6432_vm9 = vmand %vm1874_vm2, %vm1884_vm3 }
 0x1b2   : > { %v1770_v21 = vadd.f32 %v6284_v17, %v4373_v45  ;;  %v6375_v33 = vadd.s32 9, %v6041_v27  ;;  %4497 = vmatpush3.bf16.msra.mxu1 %v5038_v50  ;;  %v1976_v3 = vrot.slane %v1929_v53, 7  ;;  %v4375_v27 = vpop.f32.mrf.mxu0  ;;  %v6392_v43 = vsel %vm454_vm0, %v2193_v56, %v2194_v42  ;;  %v1777_v53 = vpop.f32.mrf.mxu1 }
 0x1b3   : > { %v2119_v18 = vshrl.u32 %v2048_v52, 16  ;;  %v2123_v55 = vrot.slane %v2121_v46, 1  ;;  %4498 = vmatprep.subr.bf16.mxu1 %v5041_v39  ;;  %v1849_v4 = vmax.f32 %v1829_v26, 0.0  ;;  %v4376_v6 = vadd.f32 %v4375_v27, %v4374_v7  ;;  %4776 = vmatprep.mubr.bf16.mxu0 %v6392_v43 }
 0x1b4   : > { %v1804_v41 = vadd.f32 %v1770_v21, %v6024_v49  ;;  %v2023_v61 = vsel %vm1956_vm7, 0.0, %v1975_v5  ;;  %v4377_v12 = vpop.f32.mrf.mxu0  ;;  %v2128_v29 = vrot.slane %v2126_v37, 1  ;;  %v1977_v52 = vsel %vm1956_vm7, %v1975_v5, %v1976_v3  ;;  %4797 = vmatpush3.bf16.msra.mxu0 %v5039_v10 }
 0x1b5   : > { %v2124_v48 = vor.u32 %v2123_v55, %v2119_v18  ;;  %v2033_v50 = vsel %vm1956_vm7, %v1976_v3, 0.0  ;;  %v1930_v23 = vsel %vm6387_vm4, %v1849_v4, 0.0  ;;  %v1775_v14 = vadd.f32 %v4376_v6, %v1774_v9  ;;  %4798 = vmatprep.subr.bf16.mxu0 %v5040_v32 }
 0x1b6   : > { %v1830_v49 = vadd.f32 %v6046_v16, %v1804_v41  ;;  %v2050_v39 = vpack.c.bf16 %v1977_v52, %v2023_v61  ;;  %4499 = vmatpush3.bf16.msra.mxu1 %v5042_v35  ;;  %v1978_v34 = vrot.slane %v1930_v23, 7  ;;  %v4378_v45 = vpop.f32.mrf.mxu0  ;;  %v2051_v7 = vpack.c.bf16 %v2033_v50, %v2033_v50 }
 0x1b7   : > { %v6413_v56 = vsel %vm303_vm1, %v2124_v48, %v2128_v29  ;;  %v6415_v10 = vpack.c.bf16 %v1977_v52, %v1975_v5  ;;  %4816 = vmatprep.subr.bf16.mxu1 %v6397_v13  ;;  %v1805_v9 = vadd.f32 %v1775_v14, %v6030_v11  ;;  %v4379_v46 = vadd.f32 %v4378_v45, %v4377_v12 }
 0x1b8   : > { %v1850_v42 = vmax.f32 %v1830_v49, 0.0  ;;  %2534 = vmatprep.mubr.bf16.mxu1 %v6413_v56  ;;  %v2196_v37 = vrot.slane %v2050_v39, 1  ;;  %v4380_v26 = vpop.f32.mrf.mxu0  ;;  %vm1875_vm6 = vcmp.ge.s32.totalorder %v6375_v33, 0  ;;  %v2197_v21 = vrot.slane %v2051_v7, 1  ;;  %4799 = vmatpush3.bf16.msra.mxu0 %v5040_v32 }
 0x1b9   : > { %3940 = vmatmul.mubr.msk.bf16.gmra.mxu1 %vm6173_vm5, %v6358_v19  ;;  %v2133_v5 = vshll.u32 %v2050_v39, 16  ;;  %v2138_v35 = vshll.u32 %v2051_v7, 16  ;;  %v1831_v11 = vadd.f32 %v6046_v16, %v1805_v9  ;;  %v1778_v27 = vadd.f32 %v4379_v46, %v1777_v53  ;;  %4564 = vmatprep.subr.bf16.mxu0 %v5043_v24 }
 0x1ba   : > { %v1931_v3 = vsel %vm6387_vm4, %v1850_v42, 0.0  ;;  %vm1885_vm8 = vcmp.lt.s32.totalorder %v6375_v33, 16  ;;  %v4381_v4 = vpop.f32.mrf.mxu0  ;;  %v6437_v32 = vsel %vm454_vm0, %v2196_v37, %v2197_v21  ;;  %v2131_v17 = vshrl.u32 %v2050_v39, 16 }
 0x1bb   : > { %v1979_v18 = vrot.slane %v1931_v3, 7  ;;  %v2135_v41 = vrot.slane %v2133_v5, 1  ;;  %v1851_v6 = vmax.f32 %v1831_v11, 0.0  ;;  %v1806_v61 = vadd.f32 %v1778_v27, %v6036_v51  ;;  %4777 = vmatmul.mubr.bf16.gmra.mxu0 %v6437_v32  ;;  %vm6466_vm10 = vmand %vm1875_vm6, %vm1885_vm8 }
 0x1bc   : > { %v4382_v12 = vadd.f32 %v4381_v4, %v4380_v26  ;;  %v2024_v48 = vsel %vm1956_vm7, 0.0, %v1978_v34  ;;  %v4383_v29 = vpop.f32.mrf.mxu0  ;;  %v2140_v52 = vrot.slane %v2138_v35, 1 }
 0x1bd   : > { %v2136_v36 = vor.u32 %v2135_v41, %v2131_v17  ;;  %v1980_v50 = vsel %vm1956_vm7, %v1978_v34, %v1979_v18  ;;  %v2034_v23 = vsel %vm1956_vm7, %v1979_v18, 0.0  ;;  %v1932_v49 = vsel %vm6432_vm9, %v1851_v6, 0.0 }
 0x1be   : > { %v1832_v14 = vadd.f32 %v6046_v16, %v1806_v61  ;;  %v1783_v39 = vadd.f32 %v6341_v38, %v4382_v12  ;;  %v2052_v51 = vpack.c.bf16 %v1980_v50, %v2024_v48  ;;  %v1981_v24 = vrot.slane %v1932_v49, 7  ;;  %v4384_v45 = vpop.f32.mrf.mxu0 }
 0x1bf   : > { %v6449_v7 = vsel %vm303_vm1, %v2136_v36, %v2140_v52  ;;  %v2053_v42 = vpack.c.bf16 %v2034_v23, %v2034_v23  ;;  %v6451_v9 = vpack.c.bf16 %v1980_v50, %v1978_v34  ;;  %v4385_v53 = vadd.f32 %v4384_v45, %v4383_v29 }
 0x1c0   : > { %v1852_v46 = vmax.f32 %v1832_v14, 0.0  ;;  %v1807_v37 = vadd.f32 %v1783_v39, %v6034_v59  ;;  %2542 = vmatprep.mubr.bf16.mxu1 %v6449_v7  ;;  %v2199_v26 = vrot.slane %v2052_v51, 1  ;;  %v2145_v21 = vshll.u32 %v2052_v51, 16 }
 0x1c1   : > { %3944 = vmatmul.mubr.msk.bf16.gmra.mxu1 %vm6173_vm5, %v6415_v10  ;;  %v2200_v38 = vrot.slane %v2053_v42, 1  ;;  %v2150_v5 = vshll.u32 %v2053_v42, 16  ;;  %v1786_v3 = vadd.f32 %v6402_v28, %v4385_v53  ;;  %v2143_v18 = vshrl.u32 %v2052_v51, 16 }
 0x1c2   : > { %v1933_v35 = vsel %vm6432_vm9, %v1852_v46, 0.0  ;;  %v1833_v34 = vadd.f32 %v6046_v16, %v1807_v37  ;;  %v2147_v4 = vrot.slane %v2145_v21, 1  ;;  %v2025_v28 = vsel %vm1956_vm7, 0.0, %v1981_v24 }
 0x1c3   : > { %v1982_v11 = vrot.slane %v1933_v35, 7  ;;  %v6471_v27 = vsel %vm454_vm0, %v2199_v26, %v2200_v38  ;;  %v1808_v17 = vadd.f32 %v1786_v3, %v6039_v1  ;;  %v2152_v6 = vrot.slane %v2150_v5, 1 }
 0x1c4   : > { %v1853_v55 = vmax.f32 %v1833_v34, 0.0  ;;  %4780 = vmatprep.mubr.bf16.mxu0 %v6471_v27  ;;  %v2148_v41 = vor.u32 %v2147_v4, %v2143_v18  ;;  %v5045_v4 = vld [vmem:[%s7010_s3 + $0x1f0] sm:$0xff]  }
 0x1c5   : > { %v1983_v33 = vsel %vm1956_vm7, %v1981_v24, %v1982_v11  ;;  %v2035_v61 = vsel %vm1956_vm7, %v1982_v11, 0.0  ;;  %v1834_v48 = vadd.f32 %v6046_v16, %v1808_v17 }
 0x1c6   : > { %v1934_v12 = vsel %vm6466_vm10, %v1853_v55, 0.0  ;;  %v2054_v29 = vpack.c.bf16 %v1983_v33, %v2025_v28  ;;  %v2055_v36 = vpack.c.bf16 %v2035_v61, %v2035_v61  ;;  %v6482_v52 = vsel %vm303_vm1, %v2148_v41, %v2152_v6  ;;  %v5046_v6 = vld [vmem:[%s7010_s3 + $0x1b0] sm:$0xff]  }
 0x1c7   : > { %v6484_v1 = vpack.c.bf16 %v1983_v33, %v1981_v24  ;;  %v6486_v50 = vrot.slane %v1934_v12, 7  ;;  %v1854_v23 = vmax.f32 %v1834_v48, 0.0  ;;  %2550 = vmatprep.mubr.bf16.mxu1 %v6482_v52  ;;  %v5049_v48 = vld [vmem:[%s7010_s3 + $0x1a8] sm:$0xff]  }
 0x1c8   : > { %v2273_v49 = vrot.slane %v2054_v29, 1  ;;  %v2274_v14 = vrot.slane %v2055_v36, 1  ;;  %v2261_v39 = vshll.u32 %v2054_v29, 16  ;;  %v2266_v16 = vshll.u32 %v2055_v36, 16  ;;  %v5057_v36 = vld [vmem:[%s7010_s3 + $0x228] sm:$0xff]  }
 0x1c9   : > { %3948 = vmatmul.mubr.msk.bf16.gmra.mxu1 %vm6173_vm5, %v6451_v9  ;;  %v1935_v51 = vsel %vm6466_vm10, %v1854_v23, 0.0  ;;  %v2259_v42 = vshrl.u32 %v2054_v29, 16  ;;  %v2026_v37 = vsel %vm1956_vm7, 0.0, %v6486_v50  ;;  %v5050_v29 = vld [vmem:[%s7010_s3 + $0x1e0] sm:$0xff]   ;;  %v5063_v23 = vld [vmem:[%s7010_s3 + $0x218] sm:$0xff]  }
 0x1ca   : > { %v6495_v45 = vsel %vm454_vm0, %v2273_v49, %v2274_v14  ;;  %v1985_v24 = vrot.slane %v1935_v51, 7  ;;  %v2263_v46 = vrot.slane %v2261_v39, 1  ;;  %v2268_v26 = vrot.slane %v2266_v16, 1  ;;  %v5058_v49 = vld [vmem:[%s7010_s3 + $0x1c8] sm:$0xff]   ;;  %v5064_v14 = vld [vmem:[%s7010_s3 + $0x210] sm:$0xff]   ;;  %v5060_v16 = vld [vmem:[%s7010_s3 + $0x1c0] sm:$0xff]  }
 0x1cb   : > { %4781 = vmatmul.mubr.bf16.gmra.mxu0 %v6495_v45  ;;  %v5059_v39 = vld [vmem:[%s7010_s3 + $0x188] sm:$0xff]  }
 0x1cc   : > { %4800 = vmatprep.mubr.bf16.mxu0 %v6119_v31  ;;  %v2264_v53 = vor.u32 %v2263_v46, %v2259_v42  ;;  %v6503_v38 = vsel %vm1956_vm7, %v6486_v50, %v1985_v24  ;;  %v2036_v21 = vsel %vm1956_vm7, %v1985_v24, 0.0  ;;  %v5044_v31 = vld [vmem:[%s7010_s3 + $0x1b8] sm:$0xff]   ;;  %v5065_v51 = vld [vmem:[%s7010_s3 + $0x208] sm:$0xff]   ;;  %v5061_v24 = vld [vmem:[%s7010_s3 + $0x180] sm:$0xff]  }
 0x1cd   : > { %v2056_v5 = vpack.c.bf16 %v6503_v38, %v2026_v37  ;;  %v2057_v35 = vpack.c.bf16 %v2036_v21, %v2036_v21  ;;  %v4111_v34 = vpack.c.bf16 %v6503_v38, %v6486_v50  ;;  %v5066_v42 = vld [vmem:[%s7010_s3 + $0x200] sm:$0xff]  }
 0x1ce   : > { %v6510_v3 = vsel %vm303_vm1, %v2264_v53, %v2268_v26 }
 0x1cf   : > { %2558 = vmatprep.mubr.bf16.mxu1 %v6510_v3  ;;  %v3005_v11 = vshll.u32 %v2056_v5, 16  ;;  %v3010_v59 = vshll.u32 %v2057_v35, 16  ;;  %v3017_v18 = vrot.slane %v2056_v5, 1  ;;  %v3018_v55 = vrot.slane %v2057_v35, 1 }
 0x1d0   : > { %v3003_v17 = vshrl.u32 %v2056_v5, 16 }
 0x1d1   : > { %3952 = vmatmul.mubr.msk.bf16.gmra.mxu1 %vm6173_vm5, %v6484_v1  ;;  %v3007_v28 = vrot.slane %v3005_v11, 1  ;;  %v6525_v41 = vsel %vm454_vm0, %v3017_v18, %v3018_v55  ;;  %v3012_v61 = vrot.slane %v3010_v59, 1 }
 0x1d2   : > { %2840 = vmatprep.mubr.bf16.mxu1 %v6133_v8  ;;  %v5048_v8 = vld [vmem:[%s7010_s3 + $0x1e8] sm:$0xff]  }
 0x1d3   : > { %4801 = vmatmul.mubr.bf16.vlgmr.msra.gmra.mxu0 %v6155_v62  ;;  %v3008_v33 = vor.u32 %v3007_v28, %v3003_v17  ;;  %v5052_v62 = vld [vmem:[%s7010_s3 + $0x230] sm:$0xff]  }
 0x1d4   : > { %4804 = vmatprep.mubr.bf16.mxu0 %v6217_v60  ;;  %4565 = vmatpush3.bf16.msra.mxu0 %v5044_v31 }
 0x1d5   : > { %4566 = vmatprep.subr.bf16.mxu0 %v5045_v4  ;;  %v6535_v12 = vsel %vm303_vm1, %v3008_v33, %v3012_v61 }
 0x1d8   : > { %4567 = vmatpush3.bf16.msra.mxu0 %v5046_v6 }
 0x1d9   : > { %3980 = vmatmul.mubr.msk.bf16.vlgmr.msra.gmra.mxu1 %vm6173_vm5, %v3979_v54  ;;  %4568 = vmatprep.subr.bf16.mxu0 %v5048_v8  ;;  %v5062_v54 = vld [vmem:[%s7010_s3 + $0x220] sm:$0xff]  }
 0x1da   : > { %2848 = vmatprep.mubr.bf16.mxu1 %v6181_v20  ;;  %4817 = vmatpush3.bf16.msra.mxu1 %v6397_v13  ;;  %v5054_v20 = vld [vmem:[%s7010_s3 + $0x198] sm:$0xff]   ;;  %v5055_v13 = vld [vmem:[%s7010_s3 + $0x1d0] sm:$0xff]  }
 0x1db   : > { %4805 = vmatmul.mubr.bf16.gmra.mxu0 %v6276_v63  ;;  %4818 = vmatprep.subr.bf16.mxu1 %v5052_v62 }
 0x1dc   : > { %4808 = vmatprep.mubr.bf16.mxu0 %v6333_v15  ;;  %4569 = vmatpush3.bf16.msra.mxu0 %v5049_v48 }
 0x1dd   : > { %4570 = vmatprep.subr.bf16.mxu0 %v5050_v29 }
 0x1de   : > { %4819 = vmatpush3.bf16.msra.mxu1 %v5052_v62 }
 0x1df   : > { %4820 = vmatprep.subr.bf16.mxu1 %v5057_v36 }
 0x1e0   : > { %4571 = vmatpush3.bf16.msra.mxu0 %v5051_v58 }
 0x1e1   : > { %3984 = vmatmul.mubr.msk.bf16.gmra.mxu1 %vm6173_vm5, %v6130_v25  ;;  %4572 = vmatprep.subr.bf16.mxu0 %v5053_v47  ;;  %v5056_v25 = vld [vmem:[%s7010_s3 + $0x190] sm:$0xff]  }
 0x1e2   : > { %2856 = vmatprep.mubr.bf16.mxu1 %v6240_v22  ;;  %4821 = vmatpush3.bf16.msra.mxu1 %v5057_v36 }
 0x1e3   : > { %4809 = vmatmul.mubr.bf16.gmra.mxu0 %v6392_v43  ;;  %4822 = vmatprep.subr.bf16.mxu1 %v5062_v54 }
 0x1e4   : > { %4812 = vmatprep.mubr.bf16.mxu0 %v6437_v32  ;;  %4573 = vmatpush3.bf16.msra.mxu0 %v5054_v20 }
 0x1e5   : > { %4574 = vmatprep.subr.bf16.mxu0 %v5055_v13 }
 0x1e6   : > { %4823 = vmatpush3.bf16.msra.mxu1 %v5062_v54 }
 0x1e7   : > { %4824 = vmatprep.subr.bf16.mxu1 %v5063_v23 }
 0x1e8   : > { %4575 = vmatpush3.bf16.msra.mxu0 %v5056_v25 }
 0x1e9   : > { %3988 = vmatmul.mubr.msk.bf16.gmra.mxu1 %vm6173_vm5, %v6183_v30  ;;  %4576 = vmatprep.subr.bf16.mxu0 %v5058_v49 }
 0x1ea   : > { %2864 = vmatprep.mubr.bf16.mxu1 %v6298_v40  ;;  %4825 = vmatpush3.bf16.msra.mxu1 %v5063_v23 }
 0x1eb   : > { %4813 = vmatmul.mubr.bf16.gmra.mxu0 %v6471_v27  ;;  %4826 = vmatprep.subr.bf16.mxu1 %v5064_v14 }
 0x1ec   : > { %4577 = vmatpush3.bf16.msra.mxu0 %v5059_v39  ;;  %3246 = vmatprep.mubr.bf16.mxu0 %v6240_v22 }
 0x1ed   : > { %4578 = vmatprep.subr.bf16.mxu0 %v5060_v16 }
 0x1ee   : > { %4827 = vmatpush3.bf16.msra.mxu1 %v5064_v14 }
 0x1ef   : > { %4828 = vmatprep.subr.bf16.mxu1 %v5065_v51 }
 0x1f0   : > { %4579 = vmatpush3.bf16.msra.mxu0 %v5061_v24 }
 0x1f1   : > { %3992 = vmatmul.mubr.msk.bf16.gmra.mxu1 %vm6173_vm5, %v6242_v44 }
 0x1f2   : > { %2872 = vmatprep.mubr.bf16.mxu1 %v6356_v0  ;;  %4829 = vmatpush3.bf16.msra.mxu1 %v5065_v51 }
 0x1f3   : > { %4084 = vmatmul.mubr.msk.bf16.vlgmr.msra.gmra.mxu0 %vm6173_vm5, %v6183_v30  ;;  %4830 = vmatprep.subr.bf16.mxu1 %v5066_v42 }
 0x1f4   : > { %3254 = vmatprep.mubr.bf16.mxu0 %v6298_v40 }
 0x1f6   : > { %4831 = vmatpush3.bf16.msra.mxu1 %v5066_v42 }
 0x1f9   : > { %3996 = vmatmul.mubr.msk.bf16.gmra.mxu1 %vm6173_vm5, %v6300_v2 }
 0x1fa   : > { %2880 = vmatprep.mubr.bf16.mxu1 %v6413_v56 }
 0x1fb   : > { %4088 = vmatmul.mubr.msk.bf16.gmra.mxu0 %vm6173_vm5, %v6242_v44 }
 0x1fc   : > { %3262 = vmatprep.mubr.bf16.mxu0 %v6356_v0 }
 0x201   : > { %4000 = vmatmul.mubr.msk.bf16.gmra.mxu1 %vm6173_vm5, %v6358_v19 }
 0x202   : > { %2888 = vmatprep.mubr.bf16.mxu1 %v6449_v7 }
 0x203   : > { %4092 = vmatmul.mubr.msk.bf16.gmra.mxu0 %vm6173_vm5, %v6300_v2 }
 0x204   : > { %3270 = vmatprep.mubr.bf16.mxu0 %v6413_v56 }
 0x209   : > { %4004 = vmatmul.mubr.msk.bf16.gmra.mxu1 %vm6173_vm5, %v6415_v10 }
 0x20a   : > { %2896 = vmatprep.mubr.bf16.mxu1 %v6482_v52 }
 0x20b   : > { %4096 = vmatmul.mubr.msk.bf16.gmra.mxu0 %vm6173_vm5, %v6358_v19 }
 0x20c   : > { %3278 = vmatprep.mubr.bf16.mxu0 %v6449_v7 }
 0x211   : > { %4008 = vmatmul.mubr.msk.bf16.gmra.mxu1 %vm6173_vm5, %v6451_v9 }
 0x212   : > { %4832 = vmatprep.mubr.bf16.mxu1 %v6217_v60 }
 0x213   : > { %4100 = vmatmul.mubr.msk.bf16.gmra.mxu0 %vm6173_vm5, %v6415_v10 }
 0x214   : > { %3286 = vmatprep.mubr.bf16.mxu0 %v6482_v52 }
 0x219   : > { %4833 = vmatmul.mubr.bf16.vlgmr.msra.gmra.mxu1 %v6276_v63 }
 0x21a   : > { %4836 = vmatprep.mubr.bf16.mxu1 %v6333_v15 }
 0x21b   : > { %4104 = vmatmul.mubr.msk.bf16.gmra.mxu0 %vm6173_vm5, %v6451_v9 }
 0x21c   : > { %3294 = vmatprep.mubr.bf16.mxu0 %v6510_v3 }
 0x221   : > { %4837 = vmatmul.mubr.bf16.gmra.mxu1 %v6392_v43 }
 0x222   : > { %4840 = vmatprep.mubr.bf16.mxu1 %v6437_v32 }
 0x223   : > { %4108 = vmatmul.mubr.msk.bf16.gmra.mxu0 %vm6173_vm5, %v6484_v1 }
 0x224   : > { %3302 = vmatprep.mubr.bf16.mxu0 %v6535_v12 }
 0x229   : > { %4841 = vmatmul.mubr.bf16.gmra.mxu1 %v6471_v27 }
 0x22a   : > { %4844 = vmatprep.mubr.bf16.mxu1 %v6495_v45 }
 0x22b   : > { %4112 = vmatmul.mubr.msk.bf16.gmra.mxu0 %vm6173_vm5, %v4111_v34 }
 0x231   : > { %4845 = vmatmul.mubr.bf16.gmra.mxu1 %v6525_v41 }
 0x258   : > { %v4420_v30 = vpop.f32.mrf.mxu1 }
 0x25a   : > { %v4421_v60 = vpop.f32.mrf.mxu1 }
 0x25b   : > { %v4422_v22 = vadd.f32 %v4421_v60, %v4420_v30  ;;  %v4770_v44 = vpop.f32.mrf.mxu0 }
 0x25c   : > { %v4423_v63 = vpop.f32.mrf.mxu1 }
 0x25d   : > { %v2601_v40 = vpop.f32.mrf.mxu0 }
 0x25e   : > { %v6672_v2 = vadd.f32 %v4422_v22, %v2601_v40  ;;  %v4424_v15 = vpop.f32.mrf.mxu1 }
 0x25f   : > { %v4425_v0 = vadd.f32 %v4424_v15, %v4423_v63  ;;  %v4771_v19 = vpop.f32.mrf.mxu0 }
 0x260   : > { %v4426_v43 = vpop.f32.mrf.mxu1 }
 0x261   : > { %v2604_v56 = vpop.f32.mrf.mxu0 }
 0x262   : > { %v6674_v10 = vadd.f32 %v4425_v0, %v2604_v56  ;;  %v4427_v32 = vpop.f32.mrf.mxu1 }
 0x263   : > { %v4428_v57 = vadd.f32 %v4427_v32, %v4426_v43 }
 0x264   : > { %v4429_v7 = vpop.f32.mrf.mxu1 }
 0x265   : > { %v6676_v9 = vadd.f32 %v4770_v44, %v4428_v57 }
 0x266   : > { %v4430_v27 = vpop.f32.mrf.mxu1 }
 0x267   : > { %v4431_v52 = vadd.f32 %v4430_v27, %v4429_v7 }
 0x268   : > { %v4432_v1 = vpop.f32.mrf.mxu1 }
 0x269   : > { %v6678_v50 = vadd.f32 %v4771_v19, %v4431_v52 }
 0x26a   : > { %v4433_v45 = vpop.f32.mrf.mxu1 }
 0x26b   : > { %v4434_v46 = vadd.f32 %v4433_v45, %v4432_v1  ;;  %v4774_v37 = vpop.f32.mrf.mxu0 }
 0x26c   : > { %v4435_v53 = vpop.f32.mrf.mxu1 }
 0x26d   : > { %v2617_v26 = vpop.f32.mrf.mxu0 }
 0x26e   : > { %v6680_v38 = vadd.f32 %v4434_v46, %v2617_v26  ;;  %v4436_v21 = vpop.f32.mrf.mxu1 }
 0x26f   : > { %v4437_v5 = vadd.f32 %v4436_v21, %v4435_v53  ;;  %v4775_v35 = vpop.f32.mrf.mxu0 }
 0x271   : > { %v4438_v34 = vpop.f32.mrf.mxu1  ;;  %v2620_v3 = vpop.f32.mrf.mxu0 }
 0x272   : > { %v6682_v31 = vadd.f32 %v4437_v5, %v2620_v3 }
 0x273   : > { %v4439_v11 = vpop.f32.mrf.mxu1 }
 0x274   : > { %v4440_v59 = vadd.f32 %v4439_v11, %v4438_v34 }
 0x275   : > { %v4441_v18 = vpop.f32.mrf.mxu1 }
 0x276   : > { %v6684_v4 = vadd.f32 %v4774_v37, %v4440_v59 }
 0x277   : > { %v4442_v55 = vpop.f32.mrf.mxu1 }
 0x278   : > { %v4443_v17 = vadd.f32 %v4442_v55, %v4441_v18 }
 0x279   : > { %v4444_v28 = vpop.f32.mrf.mxu1 }
 0x27a   : > { %v6686_v41 = vadd.f32 %v4775_v35, %v4443_v17 }
 0x27b   : > { %v4445_v6 = vpop.f32.mrf.mxu1  ;;  %v4778_v61 = vpop.f32.mrf.mxu0 }
 0x27c   : > { %v4446_v33 = vadd.f32 %v4445_v6, %v4444_v28 }
 0x27d   : > { %v4447_v8 = vpop.f32.mrf.mxu1  ;;  %v2633_v12 = vpop.f32.mrf.mxu0 }
 0x27e   : > { %v6688_v62 = vadd.f32 %v4446_v33, %v2633_v12 }
 0x27f   : > { %v4448_v48 = vpop.f32.mrf.mxu1  ;;  %v4779_v36 = vpop.f32.mrf.mxu0 }
 0x280   : > { %v4449_v29 = vadd.f32 %v4448_v48, %v4447_v8 }
 0x281   : > { %v4450_v58 = vpop.f32.mrf.mxu1  ;;  %v2636_v47 = vpop.f32.mrf.mxu0 }
 0x282   : > { %v6690_v54 = vadd.f32 %v4449_v29, %v2636_v47 }
 0x283   : > { %v4451_v20 = vpop.f32.mrf.mxu1 }
 0x284   : > { %v4452_v13 = vadd.f32 %v4451_v20, %v4450_v58 }
 0x285   : > { %v4453_v23 = vpop.f32.mrf.mxu1 }
 0x286   : > { %v6692_v25 = vadd.f32 %v4778_v61, %v4452_v13 }
 0x287   : > { %v4454_v49 = vpop.f32.mrf.mxu1 }
 0x288   : > { %v4455_v14 = vadd.f32 %v4454_v49, %v4453_v23 }
 0x289   : > { %v4456_v39 = vpop.f32.mrf.mxu1 }
 0x28a   : > { %v6694_v16 = vadd.f32 %v4779_v36, %v4455_v14 }
 0x28b   : > { %v4457_v51 = vpop.f32.mrf.mxu1  ;;  %v4782_v24 = vpop.f32.mrf.mxu0 }
 0x28c   : > { %v4458_v42 = vadd.f32 %v4457_v51, %v4456_v39 }
 0x28d   : > { %v4459_v30 = vpop.f32.mrf.mxu1  ;;  %v2649_v60 = vpop.f32.mrf.mxu0 }
 0x28e   : > { %v6696_v22 = vadd.f32 %v4458_v42, %v2649_v60 }
 0x28f   : > { %v4460_v44 = vpop.f32.mrf.mxu1  ;;  %v4783_v63 = vpop.f32.mrf.mxu0 }
 0x290   : > { %v4461_v40 = vadd.f32 %v4460_v44, %v4459_v30 }
 0x291   : > { %v4462_v15 = vpop.f32.mrf.mxu1  ;;  %v2652_v0 = vpop.f32.mrf.mxu0 }
 0x292   : > { %v6698_v19 = vadd.f32 %v4461_v40, %v2652_v0 }
 0x293   : > { %v4463_v43 = vpop.f32.mrf.mxu1  ;;  %v4802_v56 = vpop.f32.mrf.mxu0 }
 0x294   : > { %v4464_v32 = vadd.f32 %v4463_v43, %v4462_v15 }
 0x295   : > { %v4465_v57 = vpop.f32.mrf.mxu1  ;;  %v2939_v7 = vpop.f32.mrf.mxu0 }
 0x296   : > { %v6700_v27 = vadd.f32 %v4782_v24, %v4464_v32 }
 0x297   : > { %v4466_v52 = vpop.f32.mrf.mxu1  ;;  %v4803_v1 = vpop.f32.mrf.mxu0 }
 0x298   : > { %v4467_v45 = vadd.f32 %v4466_v52, %v4465_v57 }
 0x299   : > { %v4500_v46 = vpop.f32.mrf.mxu1  ;;  %v2942_v37 = vpop.f32.mrf.mxu0 }
 0x29a   : > { %v6702_v53 = vadd.f32 %v4783_v63, %v4467_v45 }
 0x29b   : > { %v4501_v26 = vpop.f32.mrf.mxu1  ;;  %v4806_v21 = vpop.f32.mrf.mxu0 }
 0x29c   : > { %v4502_v5 = vadd.f32 %v4501_v26, %v4500_v46 }
 0x29d   : > { %v4503_v35 = vpop.f32.mrf.mxu1  ;;  %v2955_v34 = vpop.f32.mrf.mxu0 }
 0x29e   : > { %v2843_v3 = vadd.f32 %v4502_v5, %v6672_v2 }
 0x29f   : > { %v4504_v11 = vpop.f32.mrf.mxu1  ;;  %v4807_v59 = vpop.f32.mrf.mxu0 }
 0x2a0   : > { %v4505_v18 = vadd.f32 %v4504_v11, %v4503_v35  ;;  %v6705_v55 = vadd.f32 %v2939_v7, %v2843_v3 }
 0x2a1   : > { %v4506_v17 = vpop.f32.mrf.mxu1  ;;  %v2958_v28 = vpop.f32.mrf.mxu0 }
 0x2a2   : > { %v2846_v6 = vadd.f32 %v4505_v18, %v6674_v10 }
 0x2a3   : > { %v4507_v33 = vpop.f32.mrf.mxu1  ;;  %v6708_v61 = vpop.f32.mrf.mxu0 }
 0x2a4   : > { %v4508_v8 = vadd.f32 %v4507_v33, %v4506_v17  ;;  %v6710_v12 = vadd.f32 %v2942_v37, %v2846_v6 }
 0x2a5   : > { %v4509_v48 = vpop.f32.mrf.mxu1  ;;  %v2971_v29 = vpop.f32.mrf.mxu0 }
 0x2a6   : > { %v2851_v36 = vadd.f32 %v4508_v8, %v6676_v9 }
 0x2a7   : > { %v4510_v2 = vpop.f32.mrf.mxu1  ;;  %v6713_v58 = vpop.f32.mrf.mxu0 }
 0x2a8   : > { %v4511_v47 = vadd.f32 %v4510_v2, %v4509_v48  ;;  %v6715_v20 = vadd.f32 %v4802_v56, %v2851_v36 }
 0x2a9   : > { %v4512_v13 = vpop.f32.mrf.mxu1  ;;  %v2974_v23 = vpop.f32.mrf.mxu0 }
 0x2aa   : > { %v2854_v10 = vadd.f32 %v4511_v47, %v6678_v50 }
 0x2ab   : > { %v4513_v49 = vpop.f32.mrf.mxu1  ;;  %v6718_v14 = vpop.f32.mrf.mxu0 }
 0x2ac   : > { %v4514_v39 = vadd.f32 %v4513_v49, %v4512_v13  ;;  %v6720_v51 = vadd.f32 %v4803_v1, %v2854_v10 }
 0x2ad   : > { %v4515_v24 = vpop.f32.mrf.mxu1  ;;  %v2987_v42 = vpop.f32.mrf.mxu0 }
 0x2ae   : > { %v2859_v9 = vadd.f32 %v4514_v39, %v6680_v38 }
 0x2af   : > { %v4516_v30 = vpop.f32.mrf.mxu1  ;;  %v6723_v60 = vpop.f32.mrf.mxu0 }
 0x2b0   : > { %v4517_v44 = vadd.f32 %v4516_v30, %v4515_v24  ;;  %v6725_v63 = vadd.f32 %v2955_v34, %v2859_v9 }
 0x2b1   : > { %v4518_v40 = vpop.f32.mrf.mxu1  ;;  %v2990_v15 = vpop.f32.mrf.mxu0 }
 0x2b2   : > { %v2862_v50 = vadd.f32 %v4517_v44, %v6682_v31 }
 0x2b3   : > { %v4519_v0 = vpop.f32.mrf.mxu1  ;;  %v6728_v43 = vpop.f32.mrf.mxu0 }
 0x2b4   : > { %v4520_v56 = vadd.f32 %v4519_v0, %v4518_v40  ;;  %v6730_v32 = vadd.f32 %v2958_v28, %v2862_v50 }
 0x2b5   : > { %v4521_v57 = vpop.f32.mrf.mxu1  ;;  %v6732_v7 = vpop.f32.mrf.mxu0 }
 0x2b6   : > { %v2867_v38 = vadd.f32 %v4520_v56, %v6684_v4 }
 0x2b7   : > { %v4522_v52 = vpop.f32.mrf.mxu1  ;;  %v6735_v1 = vpop.f32.mrf.mxu0 }
 0x2b8   : > { %v4523_v45 = vadd.f32 %v4522_v52, %v4521_v57  ;;  %v6737_v46 = vadd.f32 %v4806_v21, %v2867_v38 }
 0x2b9   : > { %v4524_v37 = vpop.f32.mrf.mxu1  ;;  %v6739_v26 = vpop.f32.mrf.mxu0 }
 0x2ba   : > { %v2870_v31 = vadd.f32 %v4523_v45, %v6686_v41 }
 0x2bb   : > { %v4525_v5 = vpop.f32.mrf.mxu1  ;;  %v4586_v35 = vpop.f32.mrf.mxu0 }
 0x2bc   : > { %v4526_v34 = vadd.f32 %v4525_v5, %v4524_v37  ;;  %v6742_v3 = vadd.f32 %v4807_v59, %v2870_v31 }
 0x2bd   : > { %v4527_v11 = vpop.f32.mrf.mxu1  ;;  %v4587_v18 = vpop.f32.mrf.mxu0 }
 0x2be   : > { %v2875_v4 = vadd.f32 %v4526_v34, %v6688_v62 }
 0x2bf   : > { %v4528_v17 = vpop.f32.mrf.mxu1  ;;  %v6745_v28 = vpop.f32.mrf.mxu0 }
 0x2c0   : > { %v4529_v6 = vadd.f32 %v4528_v17, %v4527_v11  ;;  %v6747_v21 = vadd.f32 %v2971_v29, %v2875_v4  ;;  %v4588_v17 = vadd.f32 %v4587_v18, %v4586_v35  ;;  %v6802_v35 = vld [vmem:[%s7011_s4] ss:$0 sm:$0xff] }
 0x2c1   : > { %v4530_v33 = vpop.f32.mrf.mxu1  ;;  %v4590_v8 = vpop.f32.mrf.mxu0 }
 0x2c2   : > { %v2878_v48 = vadd.f32 %v4529_v6, %v6690_v54 }
 0x2c3   : > { %v4531_v41 = vpop.f32.mrf.mxu1  ;;  %v6750_v36 = vpop.f32.mrf.mxu0 }
 0x2c4   : > { %v4532_v2 = vadd.f32 %v4531_v41, %v4530_v33  ;;  %v6752_v59 = vadd.f32 %v2974_v23, %v2878_v48  ;;  %v5067_v48 = vld [vmem:[%s5356_s12 + $0x58] sm:$0x3] }
 0x2c5   : > { %v4533_v47 = vpop.f32.mrf.mxu1  ;;  %v6754_v13 = vpop.f32.mrf.mxu0  ;;  %v3495_v41 = vrot.slane %v5067_v48, 1 }
 0x2c6   : > { %v2883_v62 = vadd.f32 %v4532_v2, %v6692_v25  ;;  %v4582_v2 = vadd.f32 %v6732_v7, %v6728_v43  ;;  %v5071_v43 = vld [vmem:[%s5356_s12 + $0x38] sm:$0xff] }
 0x2c7   : > { %v4534_v10 = vpop.f32.mrf.mxu1  ;;  %v6757_v49 = vpop.f32.mrf.mxu0 }
 0x2c8   : > { %v4535_v29 = vadd.f32 %v4534_v10, %v4533_v47  ;;  %v6760_v39 = vadd.f32 %v6708_v61, %v2883_v62  ;;  %v5069_v62 = vld [vmem:[%s5356_s12 + $0x50] sm:$0xff] }
 0x2c9   : > { %v4536_v24 = vpop.f32.mrf.mxu1  ;;  %v6762_v54 = vpop.f32.mrf.mxu0  ;;  %v3493_v10 = vrot.slane %v5069_v62, 1 }
 0x2ca   : > { %v2886_v9 = vadd.f32 %v4535_v29, %v6694_v16 }
 0x2cb   : > { %v4537_v30 = vpop.f32.mrf.mxu1  ;;  %v6765_v23 = vpop.f32.mrf.mxu0 }
 0x2cc   : > { %v4538_v44 = vadd.f32 %v4537_v30, %v4536_v24  ;;  %v6768_v40 = vadd.f32 %v6713_v58, %v2886_v9  ;;  %v5070_v24 = vld [vmem:[%s5356_s12 + $0x30] sm:$0xff]  ;;  %v4591_v30 = vadd.f32 %v4590_v8, %v6745_v28  ;;  %v4585_v28 = vadd.f32 %v6739_v26, %v6735_v1 }
 0x2cd   : > { %v4539_v25 = vpop.f32.mrf.mxu1  ;;  %v6770_v50 = vpop.f32.mrf.mxu0  ;;  %v3487_v9 = vrot.slane %v5070_v24, 1  ;;  %v3496_v1 = vsel %vm454_vm0, %v3493_v10, %v3495_v41 }
 0x2ce   : > { %v2891_v0 = vadd.f32 %v4538_v44, %v6696_v22 }
 0x2cf   : > { %v4540_v56 = vpop.f32.mrf.mxu1  ;;  %v6773_v61 = vpop.f32.mrf.mxu0 }
 0x2d0   : > { %v4541_v57 = vadd.f32 %v4540_v56, %v4539_v25  ;;  %v6775_v38 = vadd.f32 %v2987_v42, %v2891_v0  ;;  %v5072_v56 = vld [vmem:[%s5356_s12 + $0x40] sm:$0x3] }
 0x2d1   : > { %v4542_v52 = vpop.f32.mrf.mxu1  ;;  %v6777_v16 = vpop.f32.mrf.mxu0 }
 0x2d2   : > { %v2894_v45 = vadd.f32 %v4541_v57, %v6698_v19  ;;  %v3490_v57 = vrot.slane %v5072_v56, 1  ;;  %v5079_v56 = vld [vmem:[%s5356_s12 + $0x68] sm:$0xff] }
 0x2d3   : > { %v4543_v37 = vpop.f32.mrf.mxu1  ;;  %v6780_v58 = vpop.f32.mrf.mxu0 }
 0x2d4   : > { %v4544_v31 = vadd.f32 %v4543_v37, %v4542_v52  ;;  %v6782_v5 = vadd.f32 %v2990_v15, %v2894_v45  ;;  %v6817_v52 = vld [vmem:[%s5356_s12 + $0x70] sm:$0x3]  ;;  %v5074_v37 = vld [vmem:[%s5356_s12 + $0x88] sm:$0x3] }
 0x2d5   : > { %v4545_v22 = vpop.f32.mrf.mxu1  ;;  %v6784_v34 = vpop.f32.mrf.mxu0  ;;  %v3500_v45 = vrot.slane %v6817_v52, 1 }
 0x2d6   : > { %v2899_v42 = vadd.f32 %v4544_v31, %v6700_v27  ;;  %v3505_v31 = vrot.slane %v5074_v37, 1  ;;  %v3498_v37 = vrot.slane %v5079_v56, 1  ;;  %v5083_v56 = vld [vmem:[%s5356_s12 + $0x98] sm:$0xff] }
 0x2d7   : > { %v4546_v11 = vpop.f32.mrf.mxu1  ;;  %v6787_v4 = vpop.f32.mrf.mxu0 }
 0x2d8   : > { %v4547_v6 = vadd.f32 %v4546_v11, %v4545_v22  ;;  %v6790_v19 = vadd.f32 %v6718_v14, %v2899_v42  ;;  %v5068_v14 = vld [vmem:[%s5356_s12 + $0x48] sm:$0xff]  ;;  %v6830_v11 = vld [vmem:[%s5356_s12 + $0xa0] sm:$0x3] }
 0x2d9   : > { %v4834_v33 = vpop.f32.mrf.mxu1  ;;  %v6792_v15 = vpop.f32.mrf.mxu0  ;;  %v3492_v18 = vrot.slane %v5068_v14, 1  ;;  %v4594_v14 = vadd.f32 %v6754_v13, %v6750_v36  ;;  %v4603_v36 = vadd.f32 %v6777_v16, %v6773_v61  ;;  %v4597_v61 = vadd.f32 %v6762_v54, %v6757_v49 }
 0x2da   : > { %v2902_v27 = vadd.f32 %v4547_v6, %v6702_v53  ;;  %v3354_v47 = vadd.f32 %v4834_v33, %v4588_v17  ;;  %v3488_v53 = vrot.slane %v5071_v43, 1  ;;  %v3510_v17 = vrot.slane %v6830_v11, 1 }
 0x2db   : > { %v3345_v29 = vpop.f32.mrf.mxu1  ;;  %v6808_v7 = vpop.f32.mrf.mxu0  ;;  %v3494_v6 = vsel %vm454_vm0, %v3492_v18, %v3493_v10  ;;  %v4600_v18 = vadd.f32 %v6770_v50, %v6765_v23  ;;  %v5077_v10 = vld [vmem:[%s5356_s12 + $0x80] sm:$0xff] }
 0x2dc   : > { %v3410_v44 = vadd.f32 %v3354_v47, %v6715_v20  ;;  %v3346_v25 = vadd.f32 %v4582_v2, %v3345_v29  ;;  %v6813_v0 = vadd.f32 %v6723_v60, %v2902_v27  ;;  %v3489_v33 = vsel %vm454_vm0, %v3487_v9, %v3488_v53  ;;  %v5076_v29 = vld [vmem:[%s5356_s12 + $0x78] sm:$0xff]  ;;  %v5078_v23 = vld [vmem:[%s5356_s12 + $0x60] sm:$0xff] }
 0x2dd   : > { %v4835_v22 = vpop.f32.mrf.mxu1  ;;  %v4611_v42 = vpop.f32.mrf.mxu0  ;;  %v3502_v41 = vrot.slane %v5076_v29, 1  ;;  %v3503_v24 = vrot.slane %v5077_v10, 1  ;;  %v3497_v50 = vrot.slane %v5078_v23, 1  ;;  %v3491_v16 = vsel %vm454_vm0, %v3488_v53, %v3490_v57  ;;  %v5081_v10 = vld [vmem:[%s5356_s12 + $0xb0] sm:$0xff] }
 0x2de   : > { %v3432_v20 = vadd.f32 %v6802_v35, %v3410_v44  ;;  %v3408_v60 = vadd.f32 %v3346_v25, %v6705_v55  ;;  %v3357_v8 = vadd.f32 %v4835_v22, %v4591_v30  ;;  %v4612_v49 = vadd.f32 %v4611_v42, %v6808_v7  ;;  %v5080_v42 = vld [vmem:[%s5356_s12 + $0xa8] sm:$0xff] }
 0x2df   : > { %v3348_v26 = vpop.f32.mrf.mxu1  ;;  %v6836_v48 = vpop.f32.mrf.mxu0  ;;  %v3499_v53 = vsel %vm454_vm0, %v3497_v50, %v3498_v37 }
 0x2e0   : > { %v3448_v2 = vmax.f32 %v3432_v20, 0.0  ;;  %v3430_v27 = vadd.f32 %v6802_v35, %v3408_v60  ;;  %v3411_v55 = vadd.f32 %v3357_v8, %v6720_v51  ;;  %v3349_v47 = vadd.f32 %v4585_v28, %v3348_v26 }
 0x2e1   : > { %v4838_v62 = vpop.f32.mrf.mxu1  ;;  %v4614_v9 = vpop.f32.mrf.mxu0 }
 0x2e2   : > { %v3545_v43 = vadd.f32 %v3494_v6, %v3448_v2  ;;  %v3446_v30 = vmax.f32 %v3430_v27, 0.0  ;;  %v3433_v51 = vadd.f32 %v6802_v35, %v3411_v55  ;;  %v3409_v44 = vadd.f32 %v3349_v47, %v6710_v12 }
 0x2e3   : > { %v3370_v13 = vadd.f32 %v4838_v62, %v4600_v18  ;;  %v3361_v25 = vpop.f32.mrf.mxu1  ;;  %v6852_v22 = vpop.f32.mrf.mxu0  ;;  %v3504_v6 = vsel %vm454_vm0, %v3502_v41, %v3503_v24  ;;  %v3512_v41 = vrot.slane %v5080_v42, 1  ;;  %v4615_v23 = vadd.f32 %v4614_v9, %v6836_v48 }
 0x2e4   : > { %3561 = vst [vmem:[%s6855_s16 + $0x10] sm:$0xff] %v3545_v43  ;;  %v3543_v28 = vadd.f32 %v3489_v33, %v3446_v30  ;;  %v3449_v20 = vmax.f32 %v3433_v51, 0.0  ;;  %v3431_v12 = vadd.f32 %v6802_v35, %v3409_v44  ;;  %v3362_v60 = vadd.f32 %v4594_v14, %v3361_v25 }
 0x2e5   : > { %v3414_v8 = vadd.f32 %v3370_v13, %v6737_v46  ;;  %v4839_v26 = vpop.f32.mrf.mxu1  ;;  %v6864_v2 = vpop.f32.mrf.mxu0  ;;  %v3506_v46 = vsel %vm454_vm0, %v3503_v24, %v3505_v31  ;;  %v3513_v43 = vrot.slane %v5081_v10, 1  ;;  %v5082_v31 = vld [vmem:[%s5356_s12 + $0x90] sm:$0xff]  ;;  %v4606_v13 = vadd.f32 %v6784_v34, %v6780_v58 }
 0x2e6   : > { %3559 = vst [vmem:[%s6855_s16] sm:$0xff] %v3543_v28  ;;  %v3546_v27 = vadd.f32 %v3496_v1, %v3449_v20  ;;  %v3447_v33 = vmax.f32 %v3431_v12, 0.0  ;;  %v3412_v55 = vadd.f32 %v3362_v60, %v6725_v63  ;;  %v3373_v47 = vadd.f32 %v4839_v26, %v4603_v36 }
 0x2e7   : > { %v3436_v54 = vadd.f32 %v6802_v35, %v3414_v8  ;;  %v3364_v57 = vpop.f32.mrf.mxu1  ;;  %v6872_v14 = vpop.f32.mrf.mxu0  ;;  %v3507_v24 = vrot.slane %v5082_v31, 1  ;;  %v3508_v28 = vrot.slane %v5083_v56, 1  ;;  %v4609_v26 = vadd.f32 %v6792_v15, %v6787_v4 }
 0x2e8   : > { %3562 = vst [vmem:[%s6855_s16 + $0x18] sm:$0xff] %v3546_v27  ;;  %v3544_v1 = vadd.f32 %v3491_v16, %v3447_v33  ;;  %v3434_v18 = vadd.f32 %v6802_v35, %v3412_v55  ;;  %v3415_v63 = vadd.f32 %v3373_v47, %v6742_v3  ;;  %v3365_v62 = vadd.f32 %v4597_v61, %v3364_v57 }
 0x2e9   : > { %v3452_v29 = vmax.f32 %v3436_v54, 0.0  ;;  %v4842_v7 = vpop.f32.mrf.mxu1  ;;  %v6879_v30 = vpop.f32.mrf.mxu0  ;;  %v3501_v58 = vsel %vm454_vm0, %v3498_v37, %v3500_v45  ;;  %v3514_v55 = vsel %vm454_vm0, %v3512_v41, %v3513_v43  ;;  %v3509_v4 = vsel %vm454_vm0, %v3507_v24, %v3508_v28  ;;  %v5086_v41 = vld [vmem:[%s5356_s12 + $0xe0] sm:$0xff] }
 0x2ea   : > { %3560 = vst [vmem:[%s6855_s16 + $0x8] sm:$0xff] %v3544_v1  ;;  %v3450_v51 = vmax.f32 %v3434_v18, 0.0  ;;  %v3437_v44 = vadd.f32 %v6802_v35, %v3415_v63  ;;  %v3413_v36 = vadd.f32 %v3365_v62, %v6730_v32  ;;  %v3386_v3 = vadd.f32 %v4842_v7, %v4612_v49  ;;  %v5084_v32 = vld [vmem:[%s5356_s12 + $0xb8] sm:$0x3] }
 0x2eb   : > { %v3549_v25 = vadd.f32 %v3504_v6, %v3452_v29  ;;  %v3377_v50 = vpop.f32.mrf.mxu1  ;;  %v4622_v20 = vpop.f32.mrf.mxu0  ;;  %v3515_v8 = vrot.slane %v5084_v32, 1  ;;  %v3511_v1 = vsel %vm454_vm0, %v3508_v28, %v3510_v17  ;;  %v3523_v10 = vrot.slane %v5086_v41, 1 }
 0x2ec   : > { %v3547_v12 = vadd.f32 %v3499_v53, %v3450_v51  ;;  %v3453_v60 = vmax.f32 %v3437_v44, 0.0  ;;  %v3435_v61 = vadd.f32 %v6802_v35, %v3413_v36  ;;  %v3418_v16 = vadd.f32 %v3386_v3, %v6760_v39  ;;  %v5087_v36 = vld [vmem:[%s5356_s12 + $0xc0] sm:$0xff] }
 0x2ed   : > { %3565 = vst [vmem:[%s6855_s16 + $0x30] sm:$0xff] %v3549_v25  ;;  %v3378_v34 = vadd.f32 %v4606_v13, %v3377_v50  ;;  %v4843_v48 = vpop.f32.mrf.mxu1  ;;  %v4623_v9 = vpop.f32.mrf.mxu0  ;;  %v4621_v51 = vadd.f32 %v6879_v30, %v6872_v14  ;;  %v3517_v3 = vrot.slane %v5087_v36, 1  ;;  %v5088_v13 = vld [vmem:[%s5356_s12 + $0xc8] sm:$0xff] }
 0x2ee   : > { %3563 = vst [vmem:[%s6855_s16 + $0x20] sm:$0xff] %v3547_v12  ;;  %v3550_v6 = vadd.f32 %v3506_v46, %v3453_v60  ;;  %v3451_v27 = vmax.f32 %v3435_v61, 0.0  ;;  %v3440_v33 = vadd.f32 %v6802_v35, %v3418_v16  ;;  %v3389_v39 = vadd.f32 %v4843_v48, %v4615_v23 }
 0x2ef   : > { %v3416_v47 = vadd.f32 %v3378_v34, %v6747_v21  ;;  %v4624_v15 = vadd.f32 %v4623_v9, %v4622_v20  ;;  %v3380_v52 = vpop.f32.mrf.mxu1  ;;  %v4625_v49 = vpop.f32.mrf.mxu0  ;;  %v4618_v46 = vadd.f32 %v6864_v2, %v6852_v22  ;;  %v3516_v21 = vsel %vm454_vm0, %v3513_v43, %v3515_v8  ;;  %v5085_v2 = vld [vmem:[%s5356_s12 + $0xd8] sm:$0xff] }
 0x2f0   : > { %3566 = vst [vmem:[%s6855_s16 + $0x38] sm:$0xff] %v3550_v6  ;;  %v3548_v45 = vadd.f32 %v3501_v58, %v3451_v27  ;;  %v3456_v37 = vmax.f32 %v3440_v33, 0.0  ;;  %v3419_v54 = vadd.f32 %v3389_v39, %v6768_v40  ;;  %v3381_v53 = vadd.f32 %v4609_v26, %v3380_v52  ;;  %v5090_v26 = vld [vmem:[%s5356_s12 + $0xd0] sm:$0x3] }
 0x2f1   : > { %v3438_v57 = vadd.f32 %v6802_v35, %v3416_v47  ;;  %v4846_v18 = vpop.f32.mrf.mxu1  ;;  %v4626_v63 = vpop.f32.mrf.mxu0  ;;  %v3522_v42 = vrot.slane %v5085_v2, 1  ;;  %v3518_v25 = vrot.slane %v5088_v13, 1 }
 0x2f2   : > { %3564 = vst [vmem:[%s6855_s16 + $0x28] sm:$0xff] %v3548_v45  ;;  %v3553_v62 = vadd.f32 %v3514_v55, %v3456_v37  ;;  %v3441_v40 = vadd.f32 %v6802_v35, %v3419_v54  ;;  %v3417_v29 = vadd.f32 %v3381_v53, %v6752_v59  ;;  %v3402_v7 = vadd.f32 %v4846_v18, %v4624_v15 }
 0x2f3   : > { %v3454_v22 = vmax.f32 %v3438_v57, 0.0  ;;  %v4627_v11 = vadd.f32 %v4626_v63, %v4625_v49  ;;  %v3393_v43 = vpop.f32.mrf.mxu1  ;;  %v3524_v14 = vsel %vm454_vm0, %v3522_v42, %v3523_v10  ;;  %v3519_v58 = vsel %vm454_vm0, %v3517_v3, %v3518_v25 }
 0x2f4   : > { %3569 = vst [vmem:[%s6855_s16 + $0x50] sm:$0xff] %v3553_v62  ;;  %v3457_v17 = vmax.f32 %v3441_v40, 0.0  ;;  %v3439_v31 = vadd.f32 %v6802_v35, %v3417_v29  ;;  %v3422_v24 = vadd.f32 %v3402_v7, %v6790_v19  ;;  %v3394_v59 = vadd.f32 %v4618_v46, %v3393_v43  ;;  %v5089_v19 = vld [vmem:[%s5356_s12 + $0xe8] sm:$0x3]  ;;  %s3592_s12 = sshll.u32 %s6855_s16, 4  ;;  %s6950_s12 = int_to_ptr.vmem [resolvable:$true] %s3592_s12 }
 0x2f5   : > { %v3551_v44 = vadd.f32 %v3509_v4, %v3454_v22  ;;  %v4847_v23 = vpop.f32.mrf.mxu1  ;;  %v3525_v12 = vrot.slane %v5089_v19, 1  ;;  %s5091_s14 = scalar_lea.vmem %s6950_s12, 2048  ;;  %p5098_p2 = scmp.lt.s32.totalorder %s6950_s12, %s5096_s15 }
 0x2f6   : > { %v3554_v50 = vadd.f32 %v3516_v21, %v3457_v17  ;;  %v3455_v56 = vmax.f32 %v3439_v31, 0.0  ;;  %v3444_v28 = vadd.f32 %v6802_v35, %v3422_v24  ;;  %v3420_v20 = vadd.f32 %v3394_v59, %v6775_v38  ;;  %p5092_p13 = scmp.ne.s32.totalorder %s6950_s12, %s5091_s14  ;;  %p5099_p4 = scmp.lt.s32.totalorder %s5097_s26, %s5091_s14 }
 0x2f7   : > { %3567 = vst [vmem:[%s6855_s16 + $0x40] sm:$0xff] %v3551_v44  ;;  %v3405_v30 = vadd.f32 %v4847_v23, %v4627_v11  ;;  %v3396_v60 = vpop.f32.mrf.mxu1  ;;  %v3520_v38 = vrot.slane %v5090_v26, 1  ;;  %v3526_v39 = vsel %vm454_vm0, %v3523_v10, %v3525_v12 }
 0x2f8   : > { %3570 = vst [vmem:[%s6855_s16 + $0x58] sm:$0xff] %v3554_v50  ;;  %v3552_v61 = vadd.f32 %v3511_v1, %v3455_v56  ;;  %v3460_v16 = vmax.f32 %v3444_v28, 0.0  ;;  %v3442_v32 = vadd.f32 %v6802_v35, %v3420_v20  ;;  %v3397_v8 = vadd.f32 %v4621_v51, %v3396_v60  ;;  %p5093_p0 = pnand %p5092_p13, %p5270_p3  ;;  %p5100_p5 = por %p5099_p4, %p5098_p2 }
 0x2f9   : > { %v3423_v34 = vadd.f32 %v3405_v30, %v6813_v0  ;;  %v3521_v47 = vsel %vm454_vm0, %v3518_v25, %v3520_v38 }
 0x2fa   : > { %3568 = vst [vmem:[%s6855_s16 + $0x48] sm:$0xff] %v3552_v61  ;;  %v3557_v48 = vadd.f32 %v3524_v14, %v3460_v16  ;;  %v3458_v9 = vmax.f32 %v3442_v32, 0.0  ;;  %v3421_v6 = vadd.f32 %v3397_v8, %v6782_v5  ;;  %p5094_p1 = pneg %p5093_p0 }
 0x2fb   : > { %v3445_v27 = vadd.f32 %v6802_v35, %v3423_v34 }
 0x2fc   : > { %3573 = vst [vmem:[%s6855_s16 + $0x70] sm:$0xff] %v3557_v48  ;;  %v3555_v33 = vadd.f32 %v3519_v58, %v3458_v9  ;;  %v3443_v55 = vadd.f32 %v6802_v35, %v3421_v6  ;;  %p5101_p6 = pnand %p5100_p5, %p5094_p1 }
 0x2fd   : > { %v3461_v0 = vmax.f32 %v3445_v27, 0.0 }
 0x2fe   : > { %3571 = vst [vmem:[%s6855_s16 + $0x60] sm:$0xff] %v3555_v33  ;;  %v3459_v4 = vmax.f32 %v3443_v55, 0.0 }
 0x2ff   : > { %v3558_v5 = vadd.f32 %v3526_v39, %v3461_v0 }
 0x300   : > { %v3556_v35 = vadd.f32 %v3521_v47, %v3459_v4 }
 0x301   : > { %3574 = vst [vmem:[%s6855_s16 + $0x78] sm:$0xff] %v3558_v5 }
 0x302   : > { %3572 = vst [vmem:[%s6855_s16 + $0x68] sm:$0xff] %v3556_v35 }
 0x303   : > { %5104 = shalt.err (!%p5101_p6)
}
 0x304   : > { %s5105_s10 = scalar_lea.hbm %s6948_s30, 2048  ;;  %s5109_s21 = scalar_lea.hbm %s7012_s5, 8192 }
 0x305   : > { %p5106_p7 = scmp.ne.s32.totalorder %s6948_s30, %s5105_s10  ;;  %p5110_p11 = scmp.lt.s32.totalorder %s6948_s30, %s7012_s5 }
 0x306   : > { %p5111_p12 = scmp.lt.s32.totalorder %s5109_s21, %s5105_s10 }
 0x307   : > { %p5107_p9 = pnand %p5106_p7, %p5270_p3 }
 0x308   : > { %p5112_p13 = por %p5111_p12, %p5110_p11 }
 0x309   : > { %p5108_p10 = pneg %p5107_p9 }
 0x30b   : > { %p5113_p0 = pnand %p5112_p13, %p5108_p10 }
 0x30d   : > { %5116 = shalt.err (!%p5113_p0)
}
 0x30e   : > { %s5187_s9 = smov 128   ;;  %s5188_s14 = smov 8  }
 0x30f   : > { %4849 = dma.vmem_to_hbm [thread:$0]  (%p5270_p3), %s6950_s12, 2048, %s6948_s30, %s6956_s8, %s5187_s9, %s5187_s9, %s5188_s14  }
 0x310 PF: > { %p4855_p1 = scmp.ge.s32.totalorder %s5183_s25, 2  ;;  %s3607_s17 = sand.u32 1, %s5155_s18  }
 0x311   : > { %s3608_s15 = scalar_lea.sflag [#allocation3], %s3607_s17 }
 0x312   : > { %p4852_p2 = pnand %p4855_p1, %p5279_p8 }
 0x314   : > { %p4853_p4 = pneg %p4852_p2 }
 0x316   : > { %5150 = dma.done.wait (%p4853_p4), %s3608_s15, 2048  }
 0x317   : > { %5152 = vsyncadd (%p4853_p4), %s3608_s15, 4294965248  ;;  %s18_s25 = sadd.s32 1, %s5183_s25   ;;  %s7039_s18 = smov %s5159_s19 }
 0x318   : > { %p15_p5 = scmp.ge.s32.totalorder %s18_s25, 6   ;;  %s7040_s19 = smov %s5163_s20 }
 0x319   : > { %s7041_s20 = smov %s5288_s11  ;;  %s7042_s21 = smov %s5175_s23 }
 0x31a   : > { %s7043_s22 = smov %s5179_s24  ;;  %s7044_s23 = smov %s7047_s28 }
 0x31b   : > { %s7045_s24 = smov %s7051_s29  ;;  %17 = sbr.rel (!%p15_p5) target bundleno = 5 (0x5), region = 80 }
 0x320   :  { %3613 = vsyncpa [#allocation3], 1 }
 0x321   :  { %3615 = vsyncpa [#allocation3 + $0x1], 1 }

</bundles_post_ra>
